<compile_context>
chip_gen: v7x
topology: tpu7x:2x2x1
jax: 0.10.0
libtpu: 0.0.40
codegen_flags: <defaults>
</compile_context>

<pallas_src>
import functools

import jax
import jax.numpy as jnp
from jax.experimental import pallas as pl
from jax.experimental.pallas import tpu as pltpu

_EPS = 1e-5
_FUSED_MAX_BYTES = 4 * 1024 * 1024      # single-block fused fast-path cutoff
_TARGET_BLOCK_BYTES = 8 * 1024 * 1024   # ~2-8 MiB blocks reach ~85%+ of roofline


# ------------------------- tiling / budget helpers -------------------------- #
def _vmem_budget_bytes():
    """Per-generation VMEM budget: ~48 MiB on v7x (64 MiB physical per TC),
    ~96 MiB on v5e/v6e (128 MiB physical)."""
    phys = 64 * 1024 * 1024
    try:
        phys = int(pltpu.get_tpu_info().vmem_capacity_bytes)
    except Exception:
        pass
    return max(32 * 1024 * 1024, min(96 * 1024 * 1024, (phys * 3) // 4))


def _axis_candidates(total, unit):
    """Legal block sizes along one axis: `total` itself (full extent is always
    legal) plus every multiple of `unit` that divides `total` exactly."""
    cands = {total}
    i = 1
    while i * i <= total:
        if total % i == 0:
            for d in (i, total // i):
                if d % unit == 0:
                    cands.add(d)
        i += 1
    return sorted(cands)


def _choose_tiles(rows, hw, itemsize, target_bytes):
    """Pick (tile_rows, tile_hw): lane tile as large as possible (lane-dense
    unmasked stores), then row tile as large as fits the per-block target."""
    hw_cands = _axis_candidates(hw, 128)   # lane axis: multiples of 128 (or full)
    r_cands = _axis_candidates(rows, 8)    # sublane axis: multiples of 8 (or full)
    min_rows = r_cands[0]
    tile_hw = hw_cands[0]
    for c in hw_cands:
        if min_rows * c * itemsize <= target_bytes:
            tile_hw = max(tile_hw, c)
    tile_rows = r_cands[0]
    for c in r_cands:
        if c * tile_hw * itemsize <= target_bytes:
            tile_rows = max(tile_rows, c)
    return tile_rows, tile_hw


# ------------------------------ kernels -------------------------------------- #
def _stats_kernel(x_ref, sum_ref, sumsq_ref):
    # x_ref:     (tile_rows, tile_hw)   rows = flattened (n, c) pairs
    # sum_ref:   (tile_rows, 1) f32     resident per-row accumulators
    # sumsq_ref: (tile_rows, 1) f32
    h = pl.program_id(1)

    @pl.when(h == 0)
    def _init():
        sum_ref[...] = jnp.zeros_like(sum_ref)
        sumsq_ref[...] = jnp.zeros_like(sumsq_ref)

    x = x_ref[...].astype(jnp.float32)
    # With >=2 MiB blocks this pass is HBM-bound: the cross-vreg part of these
    # lane reductions is plain VPU adds and the per-tile XLU epilogue stays
    # hidden behind the DMA.
    sum_ref[...] += jnp.sum(x, axis=1, keepdims=True)
    sumsq_ref[...] += jnp.sum(x * x, axis=1, keepdims=True)


def _apply_kernel(x_ref, scale_ref, shift_ref, o_ref):
    # x_ref/o_ref: (tile_rows, tile_hw);  scale/shift: (tile_rows, 1) f32
    # TODO(synk): for bf16 activations on v6e/v7x this could run fully in bf16
    # (halves vreg pressure); kept f32 so the same kernel is correct on v5e.
    x = x_ref[...].astype(jnp.float32)
    o_ref[...] = (x * scale_ref[...] + shift_ref[...]).astype(o_ref.dtype)


def _fused_kernel(x_ref, scale_ref, shift_ref, gamma_ref, beta_ref, o_ref, *,
                  inv_count):
    # Small-problem fast path: x_ref (N, C, HW) is the whole activation, so
    # batch stats and the affine apply happen in one read of x.
    xf = x_ref[...].astype(jnp.float32)
    s = jnp.sum(jnp.sum(xf, axis=2, keepdims=True), axis=0, keepdims=True)
    q = jnp.sum(jnp.sum(xf * xf, axis=2, keepdims=True), axis=0, keepdims=True)
    mean = s * inv_count                                       # (1, C, 1)
    var = jnp.maximum(q * inv_count - mean * mean, 0.0)
    inv_std = jax.lax.rsqrt(var + _EPS)
    g = gamma_ref[...] * inv_std                               # (1, C, 1)
    eff_scale = scale_ref[...] * g                             # (N, C, 1)
    eff_shift = scale_ref[...] * (beta_ref[...] - mean * g) + shift_ref[...]
    o_ref[...] = (xf * eff_scale + eff_shift).astype(o_ref.dtype)


# ------------------------------ wrapper -------------------------------------- #
def class_conditional_batchnorm2d(x_nchw, y, w_scale, w_shift, gamma, beta, *,
                                  block_bytes_target=None):
    """x_nchw: (N, C, H, W); y: (N, K); w_*: (C, K) raw Linear weights."""
    N, C, H, W = x_nchw.shape
    HW = H * W
    R = N * C
    itemsize = x_nchw.dtype.itemsize
    x_bytes = R * HW * itemsize

    budget = _vmem_budget_bytes()
    if block_bytes_target is None:
        # Apply pass pipelines two big streams x two buffers each; keep headroom.
        block_bytes_target = min(_TARGET_BLOCK_BYTES, budget // 5)

    # -------- conditional affine from y (tiny; stays outside the kernels) ----
    def spectral_normalize(w):
        # TODO(synk): PyTorch uses a stateful power-iteration sigma estimate;
        # exact SVD sigma used here (deterministic, tiny (C, K) matrices).
        return w / jnp.linalg.svd(w, compute_uv=False)[0]

    yf = y.astype(jnp.float32)
    ws = spectral_normalize(w_scale.astype(jnp.float32))         # (C, K)
    wh = spectral_normalize(w_shift.astype(jnp.float32))
    scale_nc = 1.0 + yf @ ws.T                                   # (N, C)
    shift_nc = yf @ wh.T                                         # (N, C)
    gamma_f = gamma.astype(jnp.float32)
    beta_f = beta.astype(jnp.float32)
    inv_count = 1.0 / float(N * HW)

    # ---------------- small-problem fast path: one fused kernel --------------
    if x_bytes <= min(_FUSED_MAX_BYTES, block_bytes_target):
        x3 = x_nchw.reshape(N, C, HW)                            # free view
        out3 = pl.pallas_call(
            functools.partial(_fused_kernel, inv_count=inv_count),
            grid=(1,),
            in_specs=[
                pl.BlockSpec((N, C, HW), lambda i: (0, 0, 0)),
                pl.BlockSpec((N, C, 1), lambda i: (0, 0, 0)),
                pl.BlockSpec((N, C, 1), lambda i: (0, 0, 0)),
                pl.BlockSpec((1, C, 1), lambda i: (0, 0, 0)),
                pl.BlockSpec((1, C, 1), lambda i: (0, 0, 0)),
            ],
            out_specs=pl.BlockSpec((N, C, HW), lambda i: (0, 0, 0)),
            out_shape=jax.ShapeDtypeStruct((N, C, HW), x_nchw.dtype),
            input_output_aliases={0: 0},
            compiler_params=pltpu.CompilerParams(
                dimension_semantics=("arbitrary",),
                vmem_limit_bytes=budget,
            ),
            cost_estimate=pl.CostEstimate(
                flops=int(7 * R * HW), transcendentals=int(C),
                bytes_accessed=int(2 * x_bytes)),
        )(x3, scale_nc[:, :, None], shift_nc[:, :, None],
          gamma_f[None, :, None], beta_f[None, :, None])
        return out3.reshape(N, C, H, W)

    # -------------------------- tiled two-pass path ---------------------------
    tile_r, tile_hw = _choose_tiles(R, HW, itemsize, block_bytes_target)
    num_r, num_hw = R // tile_r, HW // tile_hw

    x2 = x_nchw.reshape(R, HW)        # free view: rows = (n, c), lanes = HW

    # Pass 1: per-row sum / sum-of-squares in one read of x.
    # (Two (R, 1) outputs kept separate — known-clean lowering; writeback is
    # negligible next to the x read.)
    row_sum, row_sq = pl.pallas_call(
        _stats_kernel,
        grid=(num_r, num_hw),
        in_specs=[pl.BlockSpec((tile_r, tile_hw), lambda r, h: (r, h))],
        out_specs=[
            pl.BlockSpec((tile_r, 1), lambda r, h: (r, 0)),
            pl.BlockSpec((tile_r, 1), lambda r, h: (r, 0)),
        ],
        out_shape=[
            jax.ShapeDtypeStruct((R, 1), jnp.float32),
            jax.ShapeDtypeStruct((R, 1), jnp.float32),
        ],
        compiler_params=pltpu.CompilerParams(
            dimension_semantics=("parallel", "arbitrary"),
            vmem_limit_bytes=budget,
        ),
        cost_estimate=pl.CostEstimate(
            flops=int(3 * R * HW), transcendentals=0,
            bytes_accessed=int(x_bytes + 8 * R)),
    )(x2)

    # Stats finalize + fusion of the BN affine with the class-conditional one.
    ch_sum = jnp.sum(row_sum.reshape(N, C), axis=0)               # (C,)
    ch_sq = jnp.sum(row_sq.reshape(N, C), axis=0)
    mean = ch_sum * inv_count
    # TODO(synk): E[x^2]-E[x]^2 in f32 can lose precision for huge N*H*W with
    # |mean| >> std; the clamp guards the rsqrt.
    var = jnp.maximum(ch_sq * inv_count - mean * mean, 0.0)       # biased var
    inv_std = jax.lax.rsqrt(var + _EPS)
    g = gamma_f * inv_std                                         # (C,)
    eff_scale = (scale_nc * g[None, :]).reshape(R, 1)
    eff_shift = (scale_nc * (beta_f - mean * g)[None, :] + shift_nc).reshape(R, 1)

    # Pass 2: fused per-element multiply-add, x donated/aliased into the output.
    out2 = pl.pallas_call(
        _apply_kernel,
        grid=(num_r, num_hw),
        in_specs=[
            pl.BlockSpec((tile_r, tile_hw), lambda r, h: (r, h)),
            pl.BlockSpec((tile_r, 1), lambda r, h: (r, 0)),
            pl.BlockSpec((tile_r, 1), lambda r, h: (r, 0)),
        ],
        out_specs=pl.BlockSpec((tile_r, tile_hw), lambda r, h: (r, h)),
        out_shape=jax.ShapeDtypeStruct((R, HW), x_nchw.dtype),
        input_output_aliases={0: 0},
        compiler_params=pltpu.CompilerParams(
            dimension_semantics=("parallel", "parallel"),
            vmem_limit_bytes=budget,
        ),
        cost_estimate=pl.CostEstimate(
            flops=int(2 * R * HW), transcendentals=0,
            bytes_accessed=int(2 * x_bytes + 8 * R)),
    )(x2, eff_scale, eff_shift)

    return out2.reshape(N, C, H, W)


# ------------------------------ reference ------------------------------------ #
def _reference(x_nchw, y, w_scale, w_shift, gamma, beta):
    """Pure-JAX reference mirroring the PyTorch forward."""
    def spectral_normalize(w):
        return w / jnp.linalg.svd(w, compute_uv=False)[0]

    mean = jnp.mean(x_nchw, axis=(0, 2, 3), keepdims=True)
    var = jnp.mean((x_nchw - mean) ** 2, axis=(0, 2, 3), keepdims=True)
    normalized = (x_nchw - mean) / jnp.sqrt(var + _EPS)
    normalized = normalized * gamma[None, :, None, None] + beta[None, :, None, None]
    scale = 1.0 + y @ spectral_normalize(w_scale).T
    shift = y @ spectral_normalize(w_shift).T
    return scale[:, :, None, None] * normalized + shift[:, :, None, None]


if __name__ == "__main__":
    key = jax.random.PRNGKey(0)
    (kx, ky, kws, kwh, kx2, ky2, kws2, kwh2, kg2, kb2) = jax.random.split(key, 10)

    # Shapes consistent with the module: in_channels (class emb + noise) K = 32,
    # out_channels C = 4, activation (N=2, C=4, H=16, W=16), conditioning (N, K).
    N, C, H, W, K = 2, 4, 16, 16, 32
    x = jax.random.normal(kx, (N, C, H, W), jnp.float32)
    y = jax.random.normal(ky, (N, K), jnp.float32)
    bound = 1.0 / (K ** 0.5)
    w_scale = jax.random.uniform(kws, (C, K), jnp.float32, -bound, bound)
    w_shift = jax.random.uniform(kwh, (C, K), jnp.float32, -bound, bound)
    gamma = jnp.ones((C,), jnp.float32)
    beta = jnp.zeros((C,), jnp.float32)

    fwd = jax.jit(class_conditional_batchnorm2d,
                  donate_argnums=(0,),                 # makes the in-place alias real
                  static_argnames=("block_bytes_target",))

    ref = jax.block_until_ready(_reference(x, y, w_scale, w_shift, gamma, beta))
    out = jax.block_until_ready(fwd(x, y, w_scale, w_shift, gamma, beta))
    assert out.shape == (N, C, H, W)
    assert jnp.allclose(out, ref, atol=1e-4, rtol=1e-4), "fused path mismatch"

    # Second check exercises the tiled two-pass path (row tiling + accumulation
    # over the HW grid axis) by forcing a small per-block byte target.
    N2, C2, H2, W2 = 4, 16, 64, 64
    x2 = jax.random.normal(kx2, (N2, C2, H2, W2), jnp.float32)
    y2 = jax.random.normal(ky2, (N2, K), jnp.float32)
    w_scale2 = jax.random.uniform(kws2, (C2, K), jnp.float32, -bound, bound)
    w_shift2 = jax.random.uniform(kwh2, (C2, K), jnp.float32, -bound, bound)
    gamma2 = jax.random.uniform(kg2, (C2,), jnp.float32, 0.5, 1.5)
    beta2 = 0.1 * jax.random.normal(kb2, (C2,), jnp.float32)

    ref2 = jax.block_until_ready(
        _reference(x2, y2, w_scale2, w_shift2, gamma2, beta2))
    out2 = jax.block_until_ready(
        fwd(x2, y2, w_scale2, w_shift2, gamma2, beta2,
            block_bytes_target=64 * 1024))
    assert out2.shape == (N2, C2, H2, W2)
    assert jnp.allclose(out2, ref2, atol=1e-3, rtol=1e-3), "tiled path mismatch"

    print("KERNEL_OK")
</pallas_src>

<mosaic_0001>
module attributes {stable_mosaic.version = 11 : i64} {
  func.func @_fused_kernel(%arg0: i32, %arg1: memref<2x4x256xf32, #tpu.memory_space<vmem>>, %arg2: memref<2x4x1xf32, #tpu.memory_space<vmem>>, %arg3: memref<2x4x1xf32, #tpu.memory_space<vmem>>, %arg4: memref<1x4x1xf32, #tpu.memory_space<vmem>>, %arg5: memref<1x4x1xf32, #tpu.memory_space<vmem>>, %arg6: memref<2x4x256xf32, #tpu.memory_space<vmem>>) attributes {dimension_semantics = [#tpu.dimension_semantics<arbitrary>], iteration_bounds = array<i64: 1>, scalar_prefetch = 0 : i64, scratch_operands = 0 : i64, tpu.core_type = #tpu.core_type<tc>, window_params = [{pipeline_mode = #tpu.pipeline_mode<synchronous>, transform_indices = @transform_0, window_bounds = array<i64: 2, 4, 256>}, {pipeline_mode = #tpu.pipeline_mode<synchronous>, transform_indices = @transform_1, window_bounds = array<i64: 2, 4, 1>}, {pipeline_mode = #tpu.pipeline_mode<synchronous>, transform_indices = @transform_2, window_bounds = array<i64: 2, 4, 1>}, {pipeline_mode = #tpu.pipeline_mode<synchronous>, transform_indices = @transform_3, window_bounds = array<i64: 1, 4, 1>}, {pipeline_mode = #tpu.pipeline_mode<synchronous>, transform_indices = @transform_4, window_bounds = array<i64: 1, 4, 1>}, {pipeline_mode = #tpu.pipeline_mode<synchronous>, transform_indices = @transform_5, window_bounds = array<i64: 2, 4, 256>}]} {
    %c0 = arith.constant 0 : index
    %c0_0 = arith.constant 0 : index
    %c0_1 = arith.constant 0 : index
    %0 = vector.load %arg1[%c0, %c0_0, %c0_1] : memref<2x4x256xf32, #tpu.memory_space<vmem>>, vector<2x4x256xf32>
    %cst = arith.constant dense<0.000000e+00> : vector<2x4xf32>
    %1 = vector.multi_reduction <add>, %0, %cst [2] : vector<2x4x256xf32> to vector<2x4xf32>
    %2 = vector.shape_cast %1 : vector<2x4xf32> to vector<2x4x1xf32>
    %cst_2 = arith.constant dense<0.000000e+00> : vector<4x1xf32>
    %3 = vector.multi_reduction <add>, %2, %cst_2 [0] : vector<2x4x1xf32> to vector<4x1xf32>
    %4 = vector.shape_cast %3 : vector<4x1xf32> to vector<1x4x1xf32>
    %5 = arith.mulf %0, %0 : vector<2x4x256xf32>
    %cst_3 = arith.constant dense<0.000000e+00> : vector<2x4xf32>
    %6 = vector.multi_reduction <add>, %5, %cst_3 [2] : vector<2x4x256xf32> to vector<2x4xf32>
    %7 = vector.shape_cast %6 : vector<2x4xf32> to vector<2x4x1xf32>
    %cst_4 = arith.constant dense<0.000000e+00> : vector<4x1xf32>
    %8 = vector.multi_reduction <add>, %7, %cst_4 [0] : vector<2x4x1xf32> to vector<4x1xf32>
    %9 = vector.shape_cast %8 : vector<4x1xf32> to vector<1x4x1xf32>
    %cst_5 = arith.constant 0.001953125 : f32
    %10 = vector.broadcast %cst_5 : f32 to vector<1x4x1xf32>
    %11 = arith.mulf %4, %10 : vector<1x4x1xf32>
    %cst_6 = arith.constant 0.001953125 : f32
    %12 = vector.broadcast %cst_6 : f32 to vector<1x4x1xf32>
    %13 = arith.mulf %9, %12 : vector<1x4x1xf32>
    %14 = arith.mulf %11, %11 : vector<1x4x1xf32>
    %15 = arith.subf %13, %14 : vector<1x4x1xf32>
    %cst_7 = arith.constant 0.000000e+00 : f32
    %16 = vector.broadcast %cst_7 : f32 to vector<1x4x1xf32>
    %17 = arith.maximumf %15, %16 : vector<1x4x1xf32>
    %cst_8 = arith.constant 9.99999974E-6 : f32
    %18 = vector.broadcast %cst_8 : f32 to vector<1x4x1xf32>
    %19 = arith.addf %17, %18 : vector<1x4x1xf32>
    %20 = math.rsqrt %19 : vector<1x4x1xf32>
    %c0_9 = arith.constant 0 : index
    %c0_10 = arith.constant 0 : index
    %c0_11 = arith.constant 0 : index
    %21 = vector.load %arg4[%c0_9, %c0_10, %c0_11] : memref<1x4x1xf32, #tpu.memory_space<vmem>>, vector<1x4x1xf32>
    %22 = arith.mulf %21, %20 : vector<1x4x1xf32>
    %c0_12 = arith.constant 0 : index
    %c0_13 = arith.constant 0 : index
    %c0_14 = arith.constant 0 : index
    %23 = vector.load %arg2[%c0_12, %c0_13, %c0_14] : memref<2x4x1xf32, #tpu.memory_space<vmem>>, vector<2x4x1xf32>
    %24 = vector.broadcast %22 : vector<1x4x1xf32> to vector<2x4x1xf32>
    %25 = arith.mulf %23, %24 : vector<2x4x1xf32>
    %c0_15 = arith.constant 0 : index
    %c0_16 = arith.constant 0 : index
    %c0_17 = arith.constant 0 : index
    %26 = vector.load %arg2[%c0_15, %c0_16, %c0_17] : memref<2x4x1xf32, #tpu.memory_space<vmem>>, vector<2x4x1xf32>
    %c0_18 = arith.constant 0 : index
    %c0_19 = arith.constant 0 : index
    %c0_20 = arith.constant 0 : index
    %27 = vector.load %arg5[%c0_18, %c0_19, %c0_20] : memref<1x4x1xf32, #tpu.memory_space<vmem>>, vector<1x4x1xf32>
    %28 = arith.mulf %11, %22 : vector<1x4x1xf32>
    %29 = arith.subf %27, %28 : vector<1x4x1xf32>
    %30 = vector.broadcast %29 : vector<1x4x1xf32> to vector<2x4x1xf32>
    %31 = arith.mulf %26, %30 : vector<2x4x1xf32>
    %c0_21 = arith.constant 0 : index
    %c0_22 = arith.constant 0 : index
    %c0_23 = arith.constant 0 : index
    %32 = vector.load %arg3[%c0_21, %c0_22, %c0_23] : memref<2x4x1xf32, #tpu.memory_space<vmem>>, vector<2x4x1xf32>
    %33 = arith.addf %31, %32 : vector<2x4x1xf32>
    %34 = vector.broadcast %25 : vector<2x4x1xf32> to vector<2x4x256xf32>
    %35 = arith.mulf %0, %34 : vector<2x4x256xf32>
    %36 = vector.broadcast %33 : vector<2x4x1xf32> to vector<2x4x256xf32>
    %37 = arith.addf %35, %36 : vector<2x4x256xf32>
    %c0_24 = arith.constant 0 : index
    %c0_25 = arith.constant 0 : index
    %c0_26 = arith.constant 0 : index
    %38 = vector.load %arg6[%c0_24, %c0_25, %c0_26] : memref<2x4x256xf32, #tpu.memory_space<vmem>>, vector<2x4x256xf32>
    tpu.vector_store %arg6[%c0_24, %c0_25, %c0_26], %37 {strides = array<i32>} : memref<2x4x256xf32, #tpu.memory_space<vmem>>, vector<2x4x256xf32>,
    return
  }
  func.func @transform_0(%arg0: i32) -> (i32, i32, i32) {
    %c0_i32 = arith.constant 0 : i32
    %c0_i32_0 = arith.constant 0 : i32
    %c0_i32_1 = arith.constant 0 : i32
    %c0_i32_2 = arith.constant 0 : i32
    return %c0_i32, %c0_i32_0, %c0_i32_1 : i32, i32, i32
  }
  func.func @transform_1(%arg0: i32) -> (i32, i32, i32) {
    %c0_i32 = arith.constant 0 : i32
    %c0_i32_0 = arith.constant 0 : i32
    %c0_i32_1 = arith.constant 0 : i32
    %c0_i32_2 = arith.constant 0 : i32
    return %c0_i32, %c0_i32_0, %c0_i32_1 : i32, i32, i32
  }
  func.func @transform_2(%arg0: i32) -> (i32, i32, i32) {
    %c0_i32 = arith.constant 0 : i32
    %c0_i32_0 = arith.constant 0 : i32
    %c0_i32_1 = arith.constant 0 : i32
    %c0_i32_2 = arith.constant 0 : i32
    return %c0_i32, %c0_i32_0, %c0_i32_1 : i32, i32, i32
  }
  func.func @transform_3(%arg0: i32) -> (i32, i32, i32) {
    %c0_i32 = arith.constant 0 : i32
    %c0_i32_0 = arith.constant 0 : i32
    %c0_i32_1 = arith.constant 0 : i32
    %c0_i32_2 = arith.constant 0 : i32
    return %c0_i32, %c0_i32_0, %c0_i32_1 : i32, i32, i32
  }
  func.func @transform_4(%arg0: i32) -> (i32, i32, i32) {
    %c0_i32 = arith.constant 0 : i32
    %c0_i32_0 = arith.constant 0 : i32
    %c0_i32_1 = arith.constant 0 : i32
    %c0_i32_2 = arith.constant 0 : i32
    return %c0_i32, %c0_i32_0, %c0_i32_1 : i32, i32, i32
  }
  func.func @transform_5(%arg0: i32) -> (i32, i32, i32) {
    %c0_i32 = arith.constant 0 : i32
    %c0_i32_0 = arith.constant 0 : i32
    %c0_i32_1 = arith.constant 0 : i32
    %c0_i32_2 = arith.constant 0 : i32
    return %c0_i32, %c0_i32_0, %c0_i32_1 : i32, i32, i32
  }
}

</mosaic_0001>

<bundles_post_ra>
// kernel: custom-call.61
= control target key start
LH: loop header
LB: loop body
LE: loop exit
PB: predicated region body
PF: predicated region fallthrough
CT: control target
= control target key end

     0   :  { %4 = vsyncpa [#allocation4], 0  ;;  %v544_v4 = vmov 0.0   ;;  %s574_s17 = smov 0   ;;  %s742_s0 = inlined_call_operand.vmem [shape: f32[32,4], index: 0, kind: input, shape index: {}]   ;;  %s743_s1 = inlined_call_operand.vmem [shape: f32[32,4], index: 1, kind: output, shape index: {0}]   ;;  %s744_s2 = inlined_call_operand.hbm [shape: f32[4], index: 2, kind: output, shape index: {1}]  }
   0x1   :  { %v38_v0 = vld [vmem:[%s742_s0] sm:$0xff]  ;;  %v40_v1 = vld [vmem:[%s742_s0 + $0x8] sm:$0xff]  ;;  %v42_v2 = vld [vmem:[%s742_s0 + $0x10] sm:$0xff]  ;;  %63 = vst [vmem:[#allocation2] sm:$0x1] %v544_v4 }
   0x2   :  { %v44_v3 = vld [vmem:[%s742_s0 + $0x18] sm:$0xff]  ;;  %50 = vst [vmem:[#allocation1] sm:$0xff] %v38_v0  ;;  %54 = vst [vmem:[#allocation1 + $0x8] sm:$0xff] %v40_v1 }
   0x3   :  { %58 = vst [vmem:[#allocation1 + $0x10] sm:$0xff] %v42_v2  ;;  %62 = vst [vmem:[#allocation1 + $0x18] sm:$0xff] %v44_v3 }
   0x4 LB: > { %v71_v5 = vlaneseq  ;;  %v583_v8 = vstv %s542_s17  ;;  %s128_s0 = scalar_lea.vmem [#allocation1], %s542_s17  ;;  %s164_s18 = smov [#allocation1]  ;;  %s542_s17 = sphi %s574_s17, %s69_s17  }
   0x5   : > { %s240_s19 = scalar_lea.vmem [#allocation5], %s542_s17  ;;  %s651_s20 = smov [#allocation1] }
   0x6   : > { %v580_v7 = vshrl.u32 %v71_v5, 7  ;;  %s257_s21 = smov [#allocation5] }
   0x8   : > { %vm75_vm0 = vcmp.gt.s32.totalorder %v580_v7, %v583_v8  ;;  %v82_v10 = vadd.s32 8, %v580_v7  ;;  %v92_v12 = vadd.s32 16, %v580_v7  ;;  %v102_v14 = vadd.s32 24, %v580_v7 }
   0x9   : > { %v70_v6 = vld [vmem:[#allocation1] sm:$0xff]  ;;  %v79_v9 = vld [vmem:[#allocation1 + $0x8] sm:$0xff]  ;;  %v167_v7 = vmov %v580_v7 }
   0xa   : > { %v89_v11 = vld [vmem:[#allocation1 + $0x10] sm:$0xff]  ;;  %v99_v13 = vld [vmem:[#allocation1 + $0x18] sm:$0xff]  ;;  %v76_v15 = vsel %vm75_vm0, %v70_v6, 0.0  ;;  %vm84_vm1 = vcmp.gt.s32.totalorder %v82_v10, %v583_v8  ;;  %vm94_vm2 = vcmp.gt.s32.totalorder %v92_v12, %v583_v8  ;;  %vm104_vm3 = vcmp.gt.s32.totalorder %v102_v14, %v583_v8  ;;  %v597_v32 = vld [vmem:[%s128_s0] ss:$0 sm:$0xff] }
   0xb   : > { %v77_v16 = vmul.f32 %v76_v15, %v76_v15  ;;  %v85_v17 = vsel %vm84_vm1, %v79_v9, 0.0  ;;  %v95_v18 = vsel %vm94_vm2, %v89_v11, 0.0  ;;  %v107_v19 = vsel %vm104_vm3, %v99_v13, 0.0  ;;  %v474_v1 = vld [vmem:[%s164_s18 + $0x10] sm:$0xff]  ;;  %v168_v2 = vld [vmem:[%s164_s18] sm:$0xff]  ;;  %v475_v3 = vld [vmem:[%s164_s18 + $0x18] sm:$0xff] }
   0xc   : > { %v86_v20 = vmul.f32 %v85_v17, %v85_v17  ;;  %v96_v21 = vmul.f32 %v95_v18, %v95_v18  ;;  %v108_v23 = vmul.f32 %v107_v19, %v107_v19  ;;  %v130_v33 = vand.u32 2147483647, %v597_v32  ;;  %v473_v4 = vld [vmem:[%s164_s18 + $0x8] sm:$0xff] }
   0xd   : > { %vm155_vm9 = vcmp.lt.f32.partialorder %v597_v32, 0.0  ;;  %v222_v62 = vadd.s32 24, %v167_v7  ;;  %v204_v63 = vadd.s32 16, %v167_v7  ;;  %v186_v0 = vadd.s32 8, %v167_v7 }
   0xe   : > { %v87_v22 = vadd.f32 %v86_v20, %v77_v16  ;;  %v131_v38 = vmax.f32 %v130_v33, 0.0  ;;  %vm171_vm12 = vcmp.gt.s32.totalorder %v167_v7, %v583_v8  ;;  %v621_v6 = vand.u32 127, %v71_v5 }
   0xf   : > { %vm224_vm10 = vcmp.gt.s32.totalorder %v222_v62, %v583_v8  ;;  %vm225_vm11 = vcmp.lt.s32.totalorder %v222_v62, 32  ;;  %vm206_vm13 = vcmp.gt.s32.totalorder %v204_v63, %v583_v8  ;;  %vm188_vm15 = vcmp.gt.s32.totalorder %v186_v0, %v583_v8 }
  0x10   : > { %v97_v24 = vadd.f32 %v96_v21, %v87_v22  ;;  %vm226_vm14 = vmand %vm224_vm10, %vm225_vm11  ;;  %v172_v9 = vsel %vm171_vm12, %v168_v2, 0.0  ;;  %v207_v10 = vsel %vm206_vm13, %v474_v1, 0.0  ;;  %v189_v12 = vsel %vm188_vm15, %v473_v4, 0.0 }
  0x11   : > { %v227_v11 = vsel %vm226_vm14, %v475_v3, 0.0  ;;  %vm626_vm0 = vcmp.eq.s32.totalorder %v621_v6, %v583_v8  ;;  %v260_v7 = vmov %v580_v7 }
  0x12   : > { %v109_v25 = vadd.f32 %v108_v23, %v97_v24 }
  0x14   : > { %v110_v26 = vrot.slane %v109_v25, 4 }
  0x16   : > { %v111_v27 = vadd.f32 %v110_v26, %v109_v25 }
  0x18   : > { %v112_v28 = vrot.slane %v111_v27, 2 }
  0x1a   : > { %v113_v29 = vadd.f32 %v112_v28, %v111_v27 }
  0x1c   : > { %v114_v30 = vrot.slane %v113_v29, 1 }
  0x1e   : > { %v593_v31 = vadd.f32 %v114_v30, %v113_v29 }
  0x20   : > { %502 = vrsqrt.f32 %v593_v31  ;;  %vm118_vm4 = vcmp.eq.f32.partialorder %v593_v31, inf  ;;  %v121_v35 = vand.u32 2147483648, %v593_v31  ;;  %vm120_vm5 = vcmp.eq.f32.partialorder %v593_v31, 0.0 }
  0x2a   : > { %v503_v34 = vpop.eup %502 }
  0x2b   : > { %v117_v36 = vmul.f32 %v503_v34, %v593_v31 }
  0x2d   : > { %v119_v37 = vsel %vm118_vm4, %v593_v31, %v117_v36  ;;  %v545_v36 = vmov 1.0  }
  0x2e   : > { %v122_v39 = vsel %vm120_vm5, %v121_v35, %v119_v37  ;;  %v253_v37 = vld [vmem:[#allocation2] ss:$0 sm:$0xff] }
  0x2f   : > { %v132_v40 = vand.u32 2147483647, %v122_v39  ;;  %v263_v39 = vld [vmem:[%s651_s20] sm:$0xff] }
  0x31   : > { %v133_v41 = vmax.f32 %v131_v38, %v132_v40 }
  0x33   : > { %504 = vrcp.f32 %v133_v41  ;;  %vm145_vm8 = vcmp.eq.f32.partialorder %v133_v41, 0.0 }
  0x3d   : > { %v505_v42 = vpop.eup %504 }
  0x3e   : > { %v135_v43 = vmul.f32 %v505_v42, %v130_v33  ;;  %v138_v44 = vmul.f32 0.0, %v505_v42  ;;  %v142_v45 = vmul.f32 %v505_v42, %v132_v40  ;;  %v477_v40 = vld [vmem:[%s651_s20 + $0x8] sm:$0xff]  ;;  %v279_v42 = vadd.s32 24, %v260_v7 }
  0x3f   : > { %v298_v7 = vmov %v580_v7 }
  0x40   : > { %v136_v46 = vmul.f32 %v135_v43, %v135_v43  ;;  %v139_v47 = vmul.f32 %v138_v44, %v138_v44  ;;  %v143_v48 = vmul.f32 %v142_v45, %v142_v45  ;;  %v481_v43 = vld [vmem:[%s651_s20 + $0x18] sm:$0xff]  ;;  %vm285_vm1 = vcmp.lt.s32.totalorder %v279_v42, 32 }
  0x41   : > { %v340_v63 = vadd.s32 16, %v298_v7  ;;  %vm315_vm2 = vcmp.ge.s32.totalorder %v298_v7, %v583_v8  ;;  %v361_v0 = vadd.s32 24, %v298_v7 }
  0x42   : > { %v140_v49 = vadd.f32 %v139_v47, %v136_v46  ;;  %vm671_vm4 = vmand %vm626_vm0, %vm315_vm2 }
  0x44   : > { %v144_v50 = vadd.f32 %v143_v48, %v140_v49 }
  0x46   : > { %506 = vrsqrt.f32 %v144_v50  ;;  %vm148_vm6 = vcmp.eq.f32.partialorder %v144_v50, inf  ;;  %v151_v52 = vand.u32 2147483648, %v144_v50  ;;  %vm150_vm7 = vcmp.eq.f32.partialorder %v144_v50, 0.0 }
  0x50   : > { %v507_v51 = vpop.eup %506 }
  0x51   : > { %v147_v53 = vmul.f32 %v507_v51, %v144_v50 }
  0x53   : > { %v149_v54 = vsel %vm148_vm6, %v144_v50, %v147_v53  ;;  %vm378_vm6 = vcmp.ge.s32.totalorder %v361_v0, %v583_v8 }
  0x54   : > { %v152_v55 = vsel %vm150_vm7, %v151_v52, %v149_v54  ;;  %vm694_vm10 = vmand %vm626_vm0, %vm378_vm6 }
  0x55   : > { %v153_v56 = vmul.f32 %v152_v55, %v133_v41  ;;  %v479_v41 = vld [vmem:[%s651_s20 + $0x10] sm:$0xff]  ;;  %s662_s20 = smov %s651_s20 }
  0x56   : > { %v305_v2 = vld [vmem:[%s662_s20] sm:$0xff]  ;;  %v483_v3 = vld [vmem:[%s662_s20 + $0x8] sm:$0xff]  ;;  %v486_v4 = vld [vmem:[%s662_s20 + $0x10] sm:$0xff]  ;;  %s382_s22 = scalar_lea.vmem %s662_s20, %s542_s17  ;;  %s69_s17 = sadd.s32 1, %s542_s17  }
  0x57   : > { %v154_v57 = vsel %vm145_vm8, 0.0, %v153_v56  ;;  %vm307_vm8 = vcmp.gt.s32.totalorder %v621_v6, %v583_v8  ;;  %p66_p0 = scmp.ge.s32.totalorder %s69_s17, 4  }
  0x58   : > { %v156_v58 = vxor.u32 2147483648, %v154_v57  ;;  %s546_s27 = smov (%p66_p0), [#allocation3]  }
  0x59   :  { %s446_s28 = sshll.u32 (%p66_p0), %s546_s27, 4  ;;  %s447_s28 = int_to_ptr.vmem [resolvable:$true] %s446_s28 }
  0x5a   : > { %v157_v59 = vsel %vm155_vm9, %v154_v57, %v156_v58  ;;  %s512_s5 = scalar_lea.vmem (%p66_p0), %s447_s28, 16  ;;  %s516_s6 = scalar_lea.vmem (%p66_p0), %s447_s28, 32 }
  0x5b   : > { %v611_v60 = vsel %vm120_vm5, %v597_v32, %v157_v59  ;;  %508 = vrcp.f32 %v157_v59  ;;  %v158_v13 = vsub.f32 %v157_v59, %v597_v32  ;;  %p513_p1 = scmp.ne.s32.totalorder (%p66_p0), %s447_s28, %s512_s5  ;;  %p517_p2 = scmp.lt.s32.totalorder (%p66_p0), %s447_s28, %s447_s28 }
  0x5c   : > { %v163_v61 = vsub.f32 %v597_v32, %v611_v60  ;;  %p518_p3 = scmp.lt.s32.totalorder (%p66_p0), %s516_s6, %s512_s5 }
  0x5e   : > { %510 = vrcp.f32 %v163_v61  ;;  %v319_v61 = vadd.s32 8, %v298_v7  ;;  %p519_p4 = por (%p66_p0), %p518_p3, %p517_p2 }
  0x60   : > { %vm336_vm3 = vcmp.ge.s32.totalorder %v319_v61, %v583_v8  ;;  %p520_p5 = pnand (%p66_p0), %p519_p4, %p513_p1 }
  0x61   : > { %vm680_vm7 = vmand %vm626_vm0, %vm336_vm3 }
  0x65   : > { %v509_v14 = vpop.eup %508 }
  0x66   : > { %v160_v5 = vmul.f32 %v509_v14, %v158_v13 }
  0x68   : > { %v511_v15 = vpop.eup %510  ;;  %v162_v29 = vsel %vm120_vm5, 0.0, %v160_v5 }
  0x69   : > { %v209_v17 = vmul.f32 %v511_v15, %v207_v10  ;;  %v174_v18 = vmul.f32 %v511_v15, %v172_v9  ;;  %v229_v19 = vmul.f32 %v511_v15, %v227_v11  ;;  %v191_v20 = vmul.f32 %v511_v15, %v189_v12  ;;  %v489_v11 = vld [vmem:[%s662_s20 + $0x18] sm:$0xff] }
  0x6a   : > { %v246_v30 = vsel %vm626_vm0, %v162_v29, 0.0 }
  0x6b   : > { %v210_v21 = vsel %vm120_vm5, 0.0, %v209_v17  ;;  %v175_v22 = vsel %vm120_vm5, 0.0, %v174_v18  ;;  %v230_v23 = vsel %vm120_vm5, 0.0, %v229_v19  ;;  %v192_v24 = vsel %vm120_vm5, 0.0, %v191_v20 }
  0x6c   : > { %v215_v25 = vsel %vm626_vm0, %v210_v21, 0.0  ;;  %v180_v26 = vsel %vm626_vm0, %v175_v22, 0.0  ;;  %v235_v27 = vsel %vm626_vm0, %v230_v23, 0.0  ;;  %v197_v28 = vsel %vm626_vm0, %v192_v24, 0.0 }
  0x6d   : > { %216 = vadd.xlane.f32.xlu1 %v215_v25  ;;  %181 = vadd.xlane.f32.xlu0 %v180_v26  ;;  %vm357_vm5 = vcmp.ge.s32.totalorder %v340_v63, %v583_v8 }
  0x6e   : > { %vm688_vm9 = vmand %vm626_vm0, %vm357_vm5 }
  0x71   : > { %236 = vadd.xlane.f32.xlu1 %v235_v27  ;;  %198 = vadd.xlane.f32.xlu0 %v197_v28 }
  0x75   : > { %247 = vadd.xlane.f32.xlu0 %v246_v30 }
  0xfa   : > { %v217_v32 = vpop.xlane.xlu1 %216  ;;  %v182_v33 = vpop.xlane.xlu0 %181 }
  0xfb   : > { %219 = vst [vmem:[#allocation5 + $0x10] sm:$0xff] %v217_v32  ;;  %183 = vst [vmem:[#allocation5] sm:$0xff] %v182_v33 }
  0xfe   : > { %v237_v34 = vpop.xlane.xlu1 %236  ;;  %v199_v35 = vpop.xlane.xlu0 %198 }
  0xff   : > { %239 = vst [vmem:[#allocation5 + $0x18] sm:$0xff] %v237_v34  ;;  %201 = vst [vmem:[#allocation5 + $0x8] sm:$0xff] %v199_v35 }
 0x100   : > { %241 = vst [vmem:[%s240_s19] sm:$0x1] %v545_v36 }
 0x102   : > { %v248_v31 = vpop.xlane.xlu0 %247 }
 0x103   : > { %v254_v38 = vsel %vm626_vm0, %v248_v31, %v253_v37 }
 0x104   : > { %255 = vst [vmem:[#allocation2] sm:$0x1] %v254_v38 }
 0x107   : > { %v262_v44 = vld [vmem:[%s257_s21] sm:$0xff]  ;;  %v476_v45 = vld [vmem:[%s257_s21 + $0x8] sm:$0xff]  ;;  %v478_v46 = vld [vmem:[%s257_s21 + $0x10] sm:$0xff] }
 0x108   : > { %v264_v47 = vmul.f32 %v263_v39, %v262_v44  ;;  %v270_v48 = vmul.f32 %v477_v40, %v476_v45  ;;  %v480_v49 = vld [vmem:[%s257_s21 + $0x18] sm:$0xff]  ;;  %v277_v52 = vmul.f32 %v479_v41, %v478_v46  ;;  %s295_s21 = smov %s257_s21 }
 0x109   : > { %v284_v50 = vmul.f32 %v481_v43, %v480_v49  ;;  %v303_v9 = vld [vmem:[%s295_s21] sm:$0xff]  ;;  %v482_v13 = vld [vmem:[%s295_s21 + $0x8] sm:$0xff]  ;;  %v485_v14 = vld [vmem:[%s295_s21 + $0x10] sm:$0xff] }
 0x10a   : > { %v271_v51 = vadd.f32 %v270_v48, %v264_v47  ;;  %v488_v7 = vld [vmem:[%s295_s21 + $0x18] sm:$0xff] }
 0x10b   : > { %v286_v54 = vsel %vm285_vm1, %v284_v50, 0.0  ;;  %v393_v35 = vld [vmem:[#allocation2] sm:$0x1] (%p66_p0) }
 0x10c   : > { %v278_v53 = vadd.f32 %v277_v52, %v271_v51  ;;  %395 = vst [vmem:[#allocation3] sm:$0x1] (%p66_p0), %v393_v35 }
 0x10e   : > { %v287_v55 = vadd.f32 %v286_v54, %v278_v53 }
 0x110   : > { %v288_v56 = vrot.slane %v287_v55, 4 }
 0x112   : > { %v289_v57 = vadd.f32 %v288_v56, %v287_v55 }
 0x114   : > { %v290_v58 = vrot.slane %v289_v57, 2 }
 0x116   : > { %v291_v59 = vadd.f32 %v290_v58, %v289_v57 }
 0x118   : > { %v292_v62 = vrot.slane %v291_v59, 1 }
 0x11a   : > { %v293_v1 = vadd.f32 %v292_v62, %v291_v59 }
 0x11c   : > { %v299_v12 = vmul.f32 %v293_v1, %v248_v31 }
 0x11e   : > { %v304_v17 = vmul.f32 %v303_v9, %v299_v12  ;;  %v324_v18 = vmul.f32 %v482_v13, %v299_v12  ;;  %v345_v19 = vmul.f32 %v485_v14, %v299_v12  ;;  %v366_v20 = vmul.f32 %v488_v7, %v299_v12 }
 0x120   : > { %v308_v22 = vsub.f32 %v305_v2, %v304_v17  ;;  %v329_v23 = vsub.f32 %v483_v3, %v324_v18  ;;  %v350_v8 = vsub.f32 %v486_v4, %v345_v19  ;;  %v371_v6 = vsub.f32 %v489_v11, %v366_v20 }
 0x122   : > { %v309_v24 = vsel %vm307_vm8, %v308_v22, %v305_v2  ;;  %v330_v25 = vsel %vm307_vm8, %v329_v23, %v483_v3  ;;  %v351_v26 = vsel %vm307_vm8, %v350_v8, %v486_v4  ;;  %v372_v27 = vsel %vm307_vm8, %v371_v6, %v489_v11 }
 0x123   : > { %v317_v28 = vsel %vm671_vm4, %v303_v9, %v309_v24  ;;  %v338_v29 = vsel %vm680_vm7, %v482_v13, %v330_v25  ;;  %v359_v30 = vsel %vm688_vm9, %v485_v14, %v351_v26  ;;  %v380_v32 = vsel %vm694_vm10, %v488_v7, %v372_v27 }
 0x124   : > { %318 = vst [vmem:[%s662_s20] sm:$0xff] %v317_v28  ;;  %484 = vst [vmem:[%s662_s20 + $0x8] sm:$0xff] %v338_v29 }
 0x125   : > { %487 = vst [vmem:[%s662_s20 + $0x10] sm:$0xff] %v359_v30  ;;  %490 = vst [vmem:[%s662_s20 + $0x18] sm:$0xff] %v380_v32 }
 0x128   :  { %68 = sbr.rel (!%p66_p0) target bundleno = 4 (0x4), region = 132 }
 0x12c   : > { %v383_v33 = vld [vmem:[%s382_s22] ss:$0 sm:$0xff] }
 0x12d   : > { %v388_v34 = vsel %vm626_vm0, %v611_v60, %v383_v33 }
 0x12e   : > { %389 = vst [vmem:[%s382_s22] sm:$0x1] %v388_v34 }
 0x135   :  { %v429_v36 = vld [vmem:[#allocation1] sm:$0xff]  ;;  %v431_v37 = vld [vmem:[#allocation1 + $0x8] sm:$0xff]  ;;  %v433_v60 = vld [vmem:[#allocation1 + $0x10] sm:$0xff] }
 0x136   :  { %430 = vst [vmem:[%s743_s1] sm:$0xff] %v429_v36  ;;  %432 = vst [vmem:[%s743_s1 + $0x8] sm:$0xff] %v431_v37  ;;  %v435_v16 = vld [vmem:[#allocation1 + $0x18] sm:$0xff] }
 0x137   :  { %434 = vst [vmem:[%s743_s1 + $0x10] sm:$0xff] %v433_v60  ;;  %436 = vst [vmem:[%s743_s1 + $0x18] sm:$0xff] %v435_v16 }
 0x138   :  { %523 = shalt.err (!%p520_p5)
}
 0x139   :  { %s524_s9 = scalar_lea.hbm %s744_s2, 16 }
 0x13a   :  { %p525_p6 = scmp.ne.s32.totalorder %s744_s2, %s524_s9  ;;  %p528_p7 = scmp.lt.u32.totalorder %s524_s9, %s744_s2 }
 0x13c   :  { %p530_p8 = pnand %p528_p7, %p525_p6 }
 0x13e   :  { %533 = shalt.err (!%p530_p8)
}
 0x13f   :  { %449 = dma.vmem_to_hbm [thread:$0]  %s447_s28, 16, %s744_s2, [#allocation4]  }
 0x140   :  { %538 = dma.done.wait [#allocation4], 16  }
 0x141   :  { %539 = vsyncadd [#allocation4], 4294967280 }
 0x142   :  { %453 = vsyncpa [#allocation4], 1 }

// kernel: custom-call.79
= control target key start
LH: loop header
LB: loop body
LE: loop exit
PB: predicated region body
PF: predicated region fallthrough
CT: control target
= control target key end

     0   :  { %v321_v1 = vmov 0.0   ;;  %s341_s11 = smov 0   ;;  %s394_s0 = inlined_call_operand.vmem [shape: f32[8,4], index: 0, kind: input, shape index: {}]   ;;  %s395_s1 = inlined_call_operand.vmem [shape: f32[8,4], index: 1, kind: output, shape index: {0}]   ;;  %s396_s2 = inlined_call_operand.vmem [shape: f32[4], index: 2, kind: output, shape index: {1}]  }
   0x1   :  { %v31_v0 = vld [vmem:[%s394_s0] sm:$0xff]  ;;  %38 = vst [vmem:[#allocation2] sm:$0x1] %v321_v1 }
   0x2   :  { %37 = vst [vmem:[#allocation1] sm:$0xff] %v31_v0 }
   0x3 LB: > { %v46_v2 = vlaneseq  ;;  %v349_v5 = vstv %s319_s11  ;;  %s73_s0 = scalar_lea.vmem [#allocation1], %s319_s11  ;;  %s109_s12 = smov [#allocation1]  ;;  %v322_v58 = vmov 1.0   ;;  %s319_s11 = sphi %s341_s11, %s44_s11  }
   0x4   : > { %s131_s13 = scalar_lea.vmem [#allocation4], %s319_s11  ;;  %s147_s14 = smov [#allocation1] }
   0x5   : > { %v346_v4 = vshrl.u32 %v46_v2, 7  ;;  %v125_v47 = vand.u32 127, %v46_v2  ;;  %s148_s15 = smov [#allocation4] }
   0x7   : > { %vm50_vm0 = vcmp.gt.s32.totalorder %v346_v4, %v349_v5  ;;  %v112_v4 = vmov %v346_v4  ;;  %vm362_vm10 = vcmp.eq.s32.totalorder %v125_v47, %v349_v5  ;;  %vm177_vm13 = vcmp.gt.s32.totalorder %v125_v47, %v349_v5 }
   0x8   : > { %vm116_vm7 = vcmp.gt.s32.totalorder %v112_v4, %v349_v5  ;;  %vm117_vm8 = vcmp.lt.s32.totalorder %v112_v4, 8  ;;  %v144_v59 = vld [vmem:[#allocation2] ss:$0 sm:$0xff]  ;;  %v151_v4 = vmov %v346_v4 }
   0x9   : > { %v45_v3 = vld [vmem:[#allocation1] sm:$0xff]  ;;  %vm118_vm9 = vmand %vm116_vm7, %vm117_vm8  ;;  %vm156_vm11 = vcmp.lt.s32.totalorder %v151_v4, 8  ;;  %v168_v4 = vmov %v346_v4 }
   0xa   : > { %v53_v6 = vsel %vm50_vm0, %v45_v3, 0.0  ;;  %v74_v14 = vld [vmem:[%s73_s0] ss:$0 sm:$0xff]  ;;  %vm185_vm12 = vcmp.ge.s32.totalorder %v168_v4, %v349_v5 }
   0xb   : > { %v54_v7 = vmul.f32 %v53_v6, %v53_v6  ;;  %v75_v15 = vand.u32 2147483647, %v74_v14  ;;  %vm100_vm6 = vcmp.lt.f32.partialorder %v74_v14, 0.0  ;;  %v113_v44 = vld [vmem:[%s109_s12] sm:$0xff]  ;;  %vm186_vm14 = vmand %vm362_vm10, %vm185_vm12 }
   0xc   : > { %v119_v48 = vsel %vm118_vm9, %v113_v44, 0.0  ;;  %v154_v62 = vld [vmem:[%s147_s14] sm:$0xff]  ;;  %s164_s14 = smov %s147_s14 }
   0xd   : > { %v55_v8 = vrot.slane %v54_v7, 4  ;;  %v76_v20 = vmax.f32 %v75_v15, 0.0  ;;  %s189_s16 = scalar_lea.vmem %s164_s14, %s319_s11  ;;  %s44_s11 = sadd.s32 1, %s319_s11  }
   0xe   : > { %p41_p0 = scmp.ge.s32.totalorder %s44_s11, 4  }
   0xf   : > { %v56_v9 = vadd.f32 %v55_v8, %v54_v7 }
  0x11   : > { %v57_v10 = vrot.slane %v56_v9, 2 }
  0x13   : > { %v58_v11 = vadd.f32 %v57_v10, %v56_v9 }
  0x15   : > { %v59_v12 = vrot.slane %v58_v11, 1 }
  0x17   : > { %v60_v13 = vadd.f32 %v59_v12, %v58_v11  ;;  %v175_v12 = vld [vmem:[%s164_s14] sm:$0xff] }
  0x19   : > { %303 = vrsqrt.f32 %v60_v13  ;;  %vm63_vm1 = vcmp.eq.f32.partialorder %v60_v13, inf  ;;  %v66_v17 = vand.u32 2147483648, %v60_v13  ;;  %vm65_vm2 = vcmp.eq.f32.partialorder %v60_v13, 0.0 }
  0x23   : > { %v304_v16 = vpop.eup %303 }
  0x24   : > { %v62_v18 = vmul.f32 %v304_v16, %v60_v13 }
  0x26   : > { %v64_v19 = vsel %vm63_vm1, %v60_v13, %v62_v18 }
  0x27   : > { %v67_v21 = vsel %vm65_vm2, %v66_v17, %v64_v19 }
  0x28   : > { %v77_v22 = vand.u32 2147483647, %v67_v21 }
  0x2a   : > { %v78_v23 = vmax.f32 %v76_v20, %v77_v22 }
  0x2c   : > { %305 = vrcp.f32 %v78_v23  ;;  %vm90_vm5 = vcmp.eq.f32.partialorder %v78_v23, 0.0 }
  0x36   : > { %v306_v24 = vpop.eup %305 }
  0x37   : > { %v80_v25 = vmul.f32 %v306_v24, %v75_v15  ;;  %v83_v26 = vmul.f32 0.0, %v306_v24  ;;  %v87_v27 = vmul.f32 %v306_v24, %v77_v22 }
  0x39   : > { %v81_v28 = vmul.f32 %v80_v25, %v80_v25  ;;  %v84_v29 = vmul.f32 %v83_v26, %v83_v26  ;;  %v88_v30 = vmul.f32 %v87_v27, %v87_v27 }
  0x3b   : > { %v85_v31 = vadd.f32 %v84_v29, %v81_v28 }
  0x3d   : > { %v89_v32 = vadd.f32 %v88_v30, %v85_v31 }
  0x3f   : > { %307 = vrsqrt.f32 %v89_v32  ;;  %vm93_vm3 = vcmp.eq.f32.partialorder %v89_v32, inf  ;;  %v96_v34 = vand.u32 2147483648, %v89_v32  ;;  %vm95_vm4 = vcmp.eq.f32.partialorder %v89_v32, 0.0 }
  0x49   : > { %v308_v33 = vpop.eup %307 }
  0x4a   : > { %v92_v35 = vmul.f32 %v308_v33, %v89_v32 }
  0x4c   : > { %v94_v36 = vsel %vm93_vm3, %v89_v32, %v92_v35 }
  0x4d   : > { %v97_v37 = vsel %vm95_vm4, %v96_v34, %v94_v36 }
  0x4e   : > { %v98_v38 = vmul.f32 %v97_v37, %v78_v23 }
  0x50   : > { %v99_v39 = vsel %vm90_vm5, 0.0, %v98_v38 }
  0x51   : > { %v101_v40 = vxor.u32 2147483648, %v99_v39 }
  0x53   : > { %v102_v41 = vsel %vm100_vm6, %v99_v39, %v101_v40 }
  0x54   : > { %v356_v42 = vsel %vm65_vm2, %v74_v14, %v102_v41  ;;  %309 = vrcp.f32 %v102_v41  ;;  %v103_v45 = vsub.f32 %v102_v41, %v74_v14 }
  0x55   : > { %v108_v43 = vsub.f32 %v74_v14, %v356_v42 }
  0x57   : > { %311 = vrcp.f32 %v108_v43 }
  0x5e   : > { %v310_v46 = vpop.eup %309 }
  0x5f   : > { %v105_v49 = vmul.f32 %v310_v46, %v103_v45 }
  0x61   : > { %v312_v50 = vpop.eup %311  ;;  %v107_v54 = vsel %vm65_vm2, 0.0, %v105_v49 }
  0x62   : > { %v121_v51 = vmul.f32 %v312_v50, %v119_v48  ;;  %v137_v56 = vsel %vm362_vm10, %v107_v54, 0.0 }
  0x64   : > { %v122_v53 = vsel %vm65_vm2, 0.0, %v121_v51 }
  0x65   : > { %v127_v55 = vsel %vm362_vm10, %v122_v53, 0.0 }
  0x66   : > { %128 = vadd.xlane.f32.xlu0 %v127_v55 }
  0x6a   : > { %138 = vadd.xlane.f32.xlu0 %v137_v56 }
  0xf3   : > { %v129_v57 = vpop.xlane.xlu0 %128 }
  0xf4   : > { %130 = vst [vmem:[#allocation4] sm:$0xff] %v129_v57 }
  0xf5   : > { %132 = vst [vmem:[%s131_s13] sm:$0x1] %v322_v58 }
  0xf7   : > { %v139_v60 = vpop.xlane.xlu0 %138 }
  0xf8   : > { %v145_v61 = vsel %vm362_vm10, %v139_v60, %v144_v59 }
  0xf9   : > { %146 = vst [vmem:[#allocation2] sm:$0x1] %v145_v61 }
  0xfc   : > { %v153_v63 = vld [vmem:[%s148_s15] sm:$0xff]  ;;  %s165_s15 = smov %s148_s15 }
  0xfd   : > { %v155_v0 = vmul.f32 %v154_v62, %v153_v63  ;;  %v173_v11 = vld [vmem:[%s165_s15] sm:$0xff] }
  0xff   : > { %v157_v1 = vsel %vm156_vm11, %v155_v0, 0.0 }
 0x100   : > { %v158_v2 = vrot.slane %v157_v1, 4  ;;  %v200_v4 = vld [vmem:[#allocation2] sm:$0x1] (%p41_p0) }
 0x101   :  { %202 = vst [vmem:[#allocation3] sm:$0x1] (%p41_p0), %v200_v4 }
 0x102   : > { %v159_v3 = vadd.f32 %v158_v2, %v157_v1 }
 0x104   : > { %v160_v6 = vrot.slane %v159_v3, 2 }
 0x106   : > { %v161_v7 = vadd.f32 %v160_v6, %v159_v3 }
 0x108   : > { %v162_v8 = vrot.slane %v161_v7, 1  ;;  %v252_v19 = vld [vmem:[#allocation3] sm:$0x1] (%p41_p0) }
 0x109   :  { %253 = vst [vmem:[%s396_s2] sm:$0x1] (%p41_p0), %v252_v19 }
 0x10a   : > { %v163_v9 = vadd.f32 %v162_v8, %v161_v7 }
 0x10c   : > { %v169_v10 = vmul.f32 %v163_v9, %v139_v60 }
 0x10e   : > { %v174_v13 = vmul.f32 %v173_v11, %v169_v10 }
 0x110   : > { %v178_v14 = vsub.f32 %v175_v12, %v174_v13 }
 0x112   : > { %v179_v15 = vsel %vm177_vm13, %v178_v14, %v175_v12 }
 0x113   : > { %v187_v16 = vsel %vm186_vm14, %v173_v11, %v179_v15 }
 0x114   : > { %188 = vst [vmem:[%s164_s14] sm:$0xff] %v187_v16 }
 0x117   :  { %43 = sbr.rel (!%p41_p0) target bundleno = 3 (0x3), region = 139 }
 0x11b   : > { %v190_v17 = vld [vmem:[%s189_s16] ss:$0 sm:$0xff] }
 0x11c   : > { %v195_v18 = vsel %vm362_vm10, %v356_v42, %v190_v17 }
 0x11d   : > { %196 = vst [vmem:[%s189_s16] sm:$0x1] %v195_v18 }
 0x124   :  { %v230_v5 = vld [vmem:[#allocation1] sm:$0xff] }
 0x125   :  { %231 = vst [vmem:[%s395_s1] sm:$0xff] %v230_v5 }

// kernel: custom-call.80
= control target key start
LH: loop header
LB: loop body
LE: loop exit
PB: predicated region body
PF: predicated region fallthrough
CT: control target
= control target key end

     0   :  { %v68_v1 = vlaneseq  ;;  %vm82_vm1 = vcmask 31744   ;;  %s252_s0 = inlined_call_operand.vmem [shape: f32[4,4], index: 0, kind: input, shape index: {}]   ;;  %s253_s1 = inlined_call_operand.vmem [shape: f32[4,4], index: 1, kind: output, shape index: {}]  }
   0x1   :  { %v62_v0 = vld [vmem:[%s252_s0] sm:$0xf] }
   0x2   :  { %63 = vst [vmem:[#allocation1] sm:$0xf] %v62_v0  ;;  %v69_v3 = vand.u32 127, %v68_v1  ;;  %v71_v4 = vshrl.u32 %v68_v1, 7 }
   0x4   :  { %vm77_vm0 = vcmp.eq.s32.totalorder %v69_v3, 0  ;;  %vm73_vm2 = vcmp.eq.s32.totalorder %v69_v3, %v71_v4  ;;  %vm86_vm3 = vcmp.eq.s32.totalorder %v69_v3, 1  ;;  %vm97_vm4 = vcmp.eq.s32.totalorder %v69_v3, 2 }
   0x5   :  { %vm108_vm5 = vcmp.eq.s32.totalorder %v69_v3, 3 }
   0x9   :  { %v66_v2 = vld [vmem:[#allocation1] sm:$0xf] }
   0xa   :  { %67 = vst [vmem:[#allocation0] sm:$0xf] %v66_v2 }
  0x11   :  { %v74_v5 = vld [vmem:[#allocation0] sm:$0xff] }
  0x12   :  { %v81_v6 = vld [vmem:[#allocation0 + $0x1] ss:$0 sm:$0xff]  ;;  %v78_v7 = vsel %vm77_vm0, %v74_v5, 1.0  ;;  %v92_v11 = vld [vmem:[#allocation0 + $0x2] ss:$0 sm:$0xff] }
  0x13   :  { %v83_v8 = vsel %vm82_vm1, %v81_v6, 0.0  ;;  %v79_v9 = vsel %vm73_vm2, %v78_v7, 0.0  ;;  %v94_v12 = vsel %vm82_vm1, %v92_v11, 0.0  ;;  %v103_v16 = vld [vmem:[#allocation0 + $0x3] ss:$0 sm:$0xff] }
  0x14   :  { %v87_v10 = vmul.f32 %v83_v8, %v79_v9  ;;  %v105_v17 = vsel %vm82_vm1, %v103_v16, 0.0 }
  0x16   :  { %88 = vadd.xlane.f32.xlu0 %v87_v10 }
  0xa3   :  { %v89_v13 = vpop.xlane.xlu0 %88 }
  0xa4   :  { %v90_v14 = vsel %vm86_vm3, %v89_v13, %v79_v9 }
  0xa5   :  { %v98_v15 = vmul.f32 %v94_v12, %v90_v14 }
  0xa7   :  { %99 = vadd.xlane.f32.xlu0 %v98_v15 }
 0x134   :  { %v100_v18 = vpop.xlane.xlu0 %99 }
 0x135   :  { %v101_v19 = vsel %vm97_vm4, %v100_v18, %v90_v14 }
 0x136   :  { %v109_v20 = vmul.f32 %v105_v17, %v101_v19 }
 0x138   :  { %110 = vadd.xlane.f32.xlu1 %v109_v20 }
 0x1c5   :  { %v111_v21 = vpop.xlane.xlu1 %110 }
 0x1c6   :  { %v112_v22 = vsel %vm108_vm5, %v111_v21, %v101_v19 }
 0x1c7   :  { %113 = vst [vmem:[#allocation2] sm:$0xff] %v112_v22 }
 0x1ce   :  { %v117_v23 = vld [vmem:[#allocation2] sm:$0xf] }
 0x1cf   :  { %119 = vst [vmem:[#allocation3] sm:$0xf] %v117_v23 }
 0x1d6   :  { %v180_v24 = vld [vmem:[#allocation3] sm:$0xf] }
 0x1d7   :  { %181 = vst [vmem:[%s253_s1] sm:$0xf] %v180_v24 }

// kernel: custom-call.81
= control target key start
LH: loop header
LB: loop body
LE: loop exit
PB: predicated region body
PF: predicated region fallthrough
CT: control target
= control target key end

     0   :  { %v176_v0 = vmov 0.0   ;;  %vm38_vm0 = vcmask 7168   ;;  %vm56_vm1 = vcmask 15368   ;;  %vm73_vm2 = vcmask 1047553   ;;  %s193_s0 = inlined_call_operand.vmem [shape: f32[4,4], index: 0, kind: input, shape index: {}]   ;;  %s194_s1 = inlined_call_operand.vmem [shape: f32[4,4], index: 1, kind: output, shape index: {}]  }
   0x1   :  { %37 = vst [vmem:[#allocation2] sm:$0xff] %v176_v0  ;;  %v17_v2 = vld [vmem:[%s193_s0] sm:$0xf]  ;;  %vm74_vm3 = vmand %vm56_vm1, %vm73_vm2  ;;  %vm78_vm4 = vcmask 23568   ;;  %vm95_vm5 = vcmask 1047554   ;;  %vm100_vm7 = vcmask 31768  }
   0x2   :  { %18 = vst [vmem:[#allocation1] sm:$0xf] %v17_v2  ;;  %vm96_vm6 = vmand %vm78_vm4, %vm95_vm5  ;;  %vm117_vm8 = vcmask 1047555  }
   0x3   :  { %vm118_vm9 = vmand %vm100_vm7, %vm117_vm8 }
   0x8   :  { %v39_v1 = vld [vmem:[#allocation2] ss:$0 sm:$0xff] }
   0x9   :  { %v41_v3 = vmul.f32 %v39_v1, %v39_v1  ;;  %v48_v4 = vmul.f32 0.0, %v39_v1  ;;  %v35_v5 = vld [vmem:[#allocation1] sm:$0xf] }
   0xa   :  { %36 = vst [vmem:[#allocation0] sm:$0xf] %v35_v5 }
   0xb   :  { %42 = vadd.xlane.f32.xlu0 %v41_v3 }
   0xf   :  { %49 = vadd.xlane.f32.xlu0 %v48_v4 }
  0x11   :  { %v40_v6 = vld [vmem:[#allocation0] ss:$0 sm:$0xff]  ;;  %v60_v18 = vld [vmem:[#allocation0 + $0x1] ss:$0 sm:$0xff]  ;;  %v82_v30 = vld [vmem:[#allocation0 + $0x2] ss:$0 sm:$0xff] }
  0x12   :  { %v46_v10 = vld [vmem:[#allocation0] sm:$0xff] }
  0x13   :  { %v104_v42 = vld [vmem:[#allocation0 + $0x3] ss:$0 sm:$0xff] }
  0x98   :  { %v43_v7 = vpop.xlane.xlu0 %42 }
  0x99   :  { %v44_v8 = vsub.f32 %v40_v6, %v43_v7 }
  0x9b   :  { %168 = vrsqrt.f32 %v44_v8 }
  0x9c   :  { %v50_v9 = vpop.xlane.xlu0 %49 }
  0x9d   :  { %v51_v11 = vsub.f32 %v46_v10, %v50_v9 }
  0xa5   :  { %v169_v12 = vpop.eup %168 }
  0xa6   :  { %v52_v13 = vmul.f32 %v169_v12, %v51_v11 }
  0xa8   :  { %v53_v14 = vsel %vm38_vm0, %v52_v13, 0.0 }
  0xa9   :  { %55 = vst [vmem:[#allocation2] sm:$0xff] %v53_v14 }
  0xb0   :  { %v58_v15 = vld [vmem:[#allocation2 + $0x1] ss:$0 sm:$0xff] }
  0xb1   :  { %v61_v16 = vmul.f32 %v58_v15, %v58_v15  ;;  %v68_v17 = vmul.f32 %v58_v15, %v53_v14 }
  0xb3   :  { %62 = vadd.xlane.f32.xlu1 %v61_v16 }
  0xb7   :  { %69 = vadd.xlane.f32.xlu1 %v68_v17 }
 0x140   :  { %v63_v19 = vpop.xlane.xlu1 %62 }
 0x141   :  { %v64_v20 = vsub.f32 %v60_v18, %v63_v19 }
 0x143   :  { %170 = vrsqrt.f32 %v64_v20 }
 0x144   :  { %v70_v21 = vpop.xlane.xlu1 %69 }
 0x145   :  { %v71_v22 = vsub.f32 %v46_v10, %v70_v21 }
 0x14d   :  { %v171_v23 = vpop.eup %170 }
 0x14e   :  { %v72_v24 = vmul.f32 %v171_v23, %v71_v22 }
 0x150   :  { %v75_v25 = vsel %vm74_vm3, %v72_v24, 0.0 }
 0x151   :  { %v76_v26 = vadd.f32 %v75_v25, %v53_v14 }
 0x153   :  { %77 = vst [vmem:[#allocation2] sm:$0xff] %v76_v26 }
 0x15a   :  { %v80_v27 = vld [vmem:[#allocation2 + $0x2] ss:$0 sm:$0xff] }
 0x15b   :  { %v90_v28 = vmul.f32 %v80_v27, %v76_v26  ;;  %v83_v29 = vmul.f32 %v80_v27, %v80_v27 }
 0x15d   :  { %91 = vadd.xlane.f32.xlu1 %v90_v28  ;;  %84 = vadd.xlane.f32.xlu0 %v83_v29 }
 0x1ea   :  { %v85_v31 = vpop.xlane.xlu0 %84  ;;  %v92_v33 = vpop.xlane.xlu1 %91 }
 0x1eb   :  { %v86_v32 = vsub.f32 %v82_v30, %v85_v31  ;;  %v93_v34 = vsub.f32 %v46_v10, %v92_v33 }
 0x1ed   :  { %172 = vrsqrt.f32 %v86_v32 }
 0x1f7   :  { %v173_v35 = vpop.eup %172 }
 0x1f8   :  { %v94_v36 = vmul.f32 %v173_v35, %v93_v34 }
 0x1fa   :  { %v97_v37 = vsel %vm96_vm6, %v94_v36, 0.0 }
 0x1fb   :  { %v98_v38 = vadd.f32 %v97_v37, %v76_v26 }
 0x1fd   :  { %99 = vst [vmem:[#allocation2] sm:$0xff] %v98_v38 }
 0x204   :  { %v102_v39 = vld [vmem:[#allocation2 + $0x3] ss:$0 sm:$0xff] }
 0x205   :  { %v112_v40 = vmul.f32 %v102_v39, %v98_v38  ;;  %v105_v41 = vmul.f32 %v102_v39, %v102_v39 }
 0x207   :  { %113 = vadd.xlane.f32.xlu1 %v112_v40  ;;  %106 = vadd.xlane.f32.xlu0 %v105_v41 }
 0x294   :  { %v107_v43 = vpop.xlane.xlu0 %106  ;;  %v114_v45 = vpop.xlane.xlu1 %113 }
 0x295   :  { %v108_v44 = vsub.f32 %v104_v42, %v107_v43  ;;  %v115_v46 = vsub.f32 %v46_v10, %v114_v45 }
 0x297   :  { %174 = vrsqrt.f32 %v108_v44 }
 0x2a1   :  { %v175_v47 = vpop.eup %174 }
 0x2a2   :  { %v116_v48 = vmul.f32 %v175_v47, %v115_v46 }
 0x2a4   :  { %v119_v49 = vsel %vm118_vm9, %v116_v48, 0.0 }
 0x2a5   :  { %v120_v50 = vadd.f32 %v119_v49, %v98_v38 }
 0x2a7   :  { %121 = vst [vmem:[#allocation2] sm:$0xff] %v120_v50 }
 0x2ae   :  { %v125_v51 = vld [vmem:[#allocation2] sm:$0xf] }
 0x2af   :  { %127 = vst [vmem:[#allocation3] sm:$0xf] %v125_v51 }
 0x2b6   :  { %v143_v52 = vld [vmem:[#allocation3] sm:$0xf] }
 0x2b7   :  { %144 = vst [vmem:[%s194_s1] sm:$0xf] %v143_v52 }

// kernel: custom-call.82
= control target key start
LH: loop header
LB: loop body
LE: loop exit
PB: predicated region body
PF: predicated region fallthrough
CT: control target
= control target key end

     0   :  { %v37_v1 = vlaneseq  ;;  %v148_v11 = vmov -1.0   ;;  %s165_s0 = inlined_call_operand.vmem [shape: f32[1,4,4], index: 0, kind: input, shape index: {}]   ;;  %s166_s1 = inlined_call_operand.vmem [shape: f32[1,4,4], index: 1, kind: output, shape index: {}]  }
   0x1   :  { %v17_v0 = vld [vmem:[%s165_s0] sm:$0xf] }
   0x2   :  { %18 = vst [vmem:[#allocation1] sm:$0xf] %v17_v0  ;;  %v38_v3 = vand.u32 127, %v37_v1  ;;  %v41_v4 = vshrl.u32 %v37_v1, 7 }
   0x4   :  { %vm39_vm0 = vcmp.lt.s32.totalorder %v38_v3, 4  ;;  %vm48_vm1 = vcmp.ge.s32.totalorder %v41_v4, %v38_v3  ;;  %vm43_vm2 = vcmp.eq.s32.totalorder %v41_v4, %v38_v3  ;;  %vm62_vm4 = vcmp.eq.s32.totalorder %v38_v3, 0 }
   0x5   :  { %vm49_vm3 = vmand %vm48_vm1, %vm39_vm0  ;;  %vm59_vm5 = vcmp.eq.s32.totalorder %v38_v3, %v41_v4  ;;  %v63_v12 = vsel %vm62_vm4, 1.0, %v148_v11  ;;  %vm70_vm6 = vcmp.eq.s32.totalorder %v38_v3, 1  ;;  %vm80_vm7 = vcmp.eq.s32.totalorder %v38_v3, 2 }
   0x6   :  { %v64_v13 = vsel %vm59_vm5, %v63_v12, 0.0  ;;  %vm90_vm8 = vcmp.eq.s32.totalorder %v38_v3, 3 }
   0x9   :  { %v35_v2 = vld [vmem:[#allocation1] sm:$0xf] }
   0xa   :  { %36 = vst [vmem:[#allocation0] sm:$0xf] %v35_v2 }
  0x11   :  { %v44_v5 = vld [vmem:[#allocation0] sm:$0xff] }
  0x12   :  { %v45_v6 = vsel %vm43_vm2, %v44_v5, 0.0  ;;  %v50_v7 = vsel %vm49_vm3, %v44_v5, 0.0 }
  0x13   :  { %46 = vadd.xlane.f32.xlu0 %v45_v6 }
  0xa0   :  { %v47_v8 = vpop.xlane.xlu0 %46 }
  0xa1   :  { %146 = vrcp.f32 %v47_v8  ;;  %vm97_vm9 = vweird.f32 %v47_v8 }
  0xab   :  { %v147_v9 = vpop.eup %146 }
  0xac   :  { %v52_v10 = vmul.f32 %v147_v9, %v50_v7 }
  0xae   :  { %53 = vst [vmem:[#allocation4] sm:$0xff] %v52_v10 }
  0xb5   :  { %v66_v14 = vld [vmem:[#allocation4 + $0x1] ss:$0 sm:$0xff]  ;;  %v76_v17 = vld [vmem:[#allocation4 + $0x2] ss:$0 sm:$0xff]  ;;  %v86_v22 = vld [vmem:[#allocation4 + $0x3] ss:$0 sm:$0xff] }
  0xb6   :  { %v67_v15 = vxor.u32 2147483648, %v66_v14  ;;  %v77_v19 = vxor.u32 2147483648, %v76_v17  ;;  %v87_v24 = vxor.u32 2147483648, %v86_v22 }
  0xb8   :  { %v71_v16 = vmul.f32 %v67_v15, %v64_v13 }
  0xba   :  { %72 = vadd.xlane.f32.xlu0 %v71_v16 }
 0x147   :  { %v73_v18 = vpop.xlane.xlu0 %72 }
 0x148   :  { %v74_v20 = vsel %vm70_vm6, %v73_v18, %v64_v13 }
 0x149   :  { %v81_v21 = vmul.f32 %v77_v19, %v74_v20 }
 0x14b   :  { %82 = vadd.xlane.f32.xlu1 %v81_v21 }
 0x1d8   :  { %v83_v23 = vpop.xlane.xlu1 %82 }
 0x1d9   :  { %v84_v25 = vsel %vm80_vm7, %v83_v23, %v74_v20 }
 0x1da   :  { %v91_v26 = vmul.f32 %v87_v24, %v84_v25 }
 0x1dc   :  { %92 = vadd.xlane.f32.xlu1 %v91_v26 }
 0x269   :  { %v93_v27 = vpop.xlane.xlu1 %92 }
 0x26a   :  { %v94_v28 = vsel %vm90_vm8, %v93_v27, %v84_v25 }
 0x26b   :  { %v96_v29 = vmul.f32 %v147_v9, %v94_v28 }
 0x26d   :  { %v98_v30 = vsel %vm97_vm9, %v94_v28, %v96_v29 }
 0x26e   :  { %99 = vst [vmem:[#allocation2] sm:$0xff] %v98_v30 }
 0x275   :  { %v103_v31 = vld [vmem:[#allocation2] sm:$0xf] }
 0x276   :  { %105 = vst [vmem:[#allocation3] sm:$0xf] %v103_v31 }
 0x27d   :  { %v121_v32 = vld [vmem:[#allocation3] sm:$0xf] }
 0x27e   :  { %122 = vst [vmem:[%s166_s1] sm:$0xf] %v121_v32 }

// kernel: reverse.2
= control target key start
LH: loop header
LB: loop body
LE: loop exit
PB: predicated region body
PF: predicated region fallthrough
CT: control target
= control target key end

     0   :  { %v2_v0 = vlaneseq  ;;  %s123_s0 = inlined_call_operand.vmem [shape: f32[4], index: 0, kind: input, shape index: {}]   ;;  %s124_s1 = inlined_call_operand.vmem [shape: f32[4], index: 1, kind: output, shape index: {}]  }
   0x2   :  { %v3_v1 = vsub.s32 3, %v2_v0 }
   0x4   :  { %4 = vset.pattern.permute.xlu0 %v3_v1 }
   0x5   :  { %v43_v2 = vld [vmem:[#allocation1] sm:$0x1]  ;;  %v21_v3 = vld [vmem:[%s123_s0] sm:$0x1]  ;;  %v58_v10 = vshrl.u32 %v2_v0, 7 }
   0x6   :  { %44 = vst [vmem:[#allocation0] sm:$0x1] %v43_v2  ;;  %22 = vst [vmem:[#allocation1 + $0x1] sm:$0x1] %v21_v3 }
   0x7   :  { %vm59_vm0 = vcmp.lt.s32.totalorder %v58_v10, 1 }
   0xd   :  { %v46_v4 = vld [vmem:[#allocation0 + $0x7] ss:$-1 sm:$0xff]  ;;  %v40_v5 = vld [vmem:[#allocation1 + $0x1] sm:$0x1] }
   0xe   :  { %v47_v6 = vrot.slane %v46_v4, 7  ;;  %42 = vst [vmem:[#allocation0 + $0x8] sm:$0x1] %v40_v5 }
  0x10   :  { %48 = vperm.xlu0 %4, %v47_v6  }
  0x15   :  { %v53_v7 = vld [vmem:[#allocation0 + $0xf] ss:$-1 sm:$0xff] }
  0x16   :  { %v54_v8 = vrot.slane %v53_v7, 7 }
  0x18   :  { %55 = vperm.xlu0 %4, %v54_v8  }
  0x8f   :  { %v49_v9 = vpop.permute.xlu0 %48 }
  0x90   :  { %50 = vst [vmem:[#allocation2] sm:$0xff] %v49_v9 }
  0x97   :  { %v56_v11 = vpop.permute.xlu0 %55 }
  0x98   :  { %60 = vst.msk [vmem:[#allocation2] sm:$0xff] %vm59_vm0, %v56_v11 }
  0x9f   :  { %v64_v12 = vld [vmem:[#allocation2] sm:$0x1] }
  0xa0   :  { %66 = vst [vmem:[#allocation3] sm:$0x1] %v64_v12 }
  0xa7   :  { %v82_v13 = vld [vmem:[#allocation3] sm:$0x1] }
  0xa8   :  { %83 = vst [vmem:[%s124_s1] sm:$0x1] %v82_v13 }

// kernel: custom-call.60
= control target key start
LH: loop header
LB: loop body
LE: loop exit
PB: predicated region body
PF: predicated region fallthrough
CT: control target
= control target key end

     0   :  { %11 = vsyncpa [#allocation14], 0  ;;  %s1850_s0 = inlined_call_operand.vmem [shape: f32[2,2], index: 0, kind: input, shape index: {}]   ;;  %s1851_s1 = inlined_call_operand.vmem [shape: f32[2,2], index: 1, kind: input, shape index: {}]   ;;  %s1852_s2 = inlined_call_operand.vmem [shape: f32[2,2], index: 2, kind: input, shape index: {}]   ;;  %s1853_s3 = inlined_call_operand.vmem [shape: f32[2,2], index: 3, kind: input, shape index: {}]   ;;  %s1854_s4 = inlined_call_operand.vmem [shape: f32[2], index: 4, kind: output, shape index: {0}]   ;;  %s1855_s5 = inlined_call_operand.vmem [shape: f32[2], index: 5, kind: output, shape index: {1}]   ;;  %s1856_s6 = inlined_call_operand.hbm [shape: f32[2,2], index: 6, kind: output, shape index: {2}]   ;;  %s1857_s7 = inlined_call_operand.hbm [shape: f32[2,2], index: 7, kind: output, shape index: {3}]   ;;  %s1858_s8 = inlined_call_operand.hbm [shape: f32[2,2], index: 8, kind: output, shape index: {4}]   ;;  %s1859_s9 = inlined_call_operand.hbm [shape: f32[2,2], index: 9, kind: output, shape index: {5}]  }
   0x1   :  { %12 = vsyncpa [#allocation17], 0 }
   0x2   :  { %13 = vsyncpa [#allocation22], 0  ;;  %v74_v0 = vld [vmem:[%s1850_s0] sm:$0x3]  ;;  %v295_v2 = vlaneseq  ;;  %v1527_v7 = vmov 0.0   ;;  %s294_s0 = smov [#allocation12] }
   0x3   :  { %v136_v1 = vld [vmem:[%s1851_s1] sm:$0x3]  ;;  %75 = vst [vmem:[#allocation1] sm:$0x3] %v74_v0  ;;  %290 = vst [vmem:[#allocation12] sm:$0xff] %v1527_v7  ;;  %s307_s1 = smov [#allocation20] }
   0x4   :  { %137 = vst [vmem:[#allocation3] sm:$0x3] %v136_v1  ;;  %v198_v3 = vld [vmem:[%s1852_s2] sm:$0x3]  ;;  %v1596_v5 = vand.u32 127, %v295_v2  ;;  %v1598_v6 = vshrl.u32 %v295_v2, 7 }
   0x5   :  { %v260_v4 = vld [vmem:[%s1853_s3] sm:$0x3]  ;;  %199 = vst [vmem:[#allocation5] sm:$0x3] %v198_v3  ;;  %291 = vst [vmem:[#allocation15] sm:$0xff] %v1527_v7  ;;  %s278_s2 = smov [#allocation23] }
   0x6   :  { %261 = vst [vmem:[#allocation7] sm:$0x3] %v260_v4  ;;  %292 = vst [vmem:[#allocation18] sm:$0xff] %v1527_v7  ;;  %v297_v5 = vmov %v1596_v5  ;;  %v300_v6 = vmov %v1598_v6  ;;  %s281_s3 = smov [#allocation24]  ;;  %s284_s17 = smov [#allocation25]  ;;  %vm1223_vm2 = vcmp.lt.s32.totalorder %v1596_v5, 2 }
   0x7   :  { %293 = vst [vmem:[#allocation20] sm:$0xff] %v1527_v7  ;;  %v310_v5 = vmov %v1596_v5  ;;  %v313_v6 = vmov %v1598_v6  ;;  %vm304_vm0 = vcmp.eq.s32.totalorder %v300_v6, %v297_v5  ;;  %s287_s18 = smov [#allocation26]  ;;  %s1219_s19 = smov [#allocation23] }
   0x8   :  { %vm317_vm1 = vcmp.eq.s32.totalorder %v313_v6, %v310_v5  ;;  %s1236_s20 = smov [#allocation24]  ;;  %v1215_v5 = vmov %v1596_v5  ;;  %v1218_v6 = vmov %v1598_v6  ;;  %s1253_s21 = smov [#allocation25] }
   0x9   :  { %s1270_s22 = smov [#allocation26]  ;;  %vm1228_vm3 = vcmp.eq.s32.totalorder %v1218_v6, %v1215_v5  ;;  %v1266_v5 = vmov %v1596_v5  ;;  %v1235_v6 = vmov %v1598_v6 }
   0xa   :  { %v264_v8 = vld [vmem:[#allocation1] sm:$0x3]  ;;  %v301_v12 = vld [vmem:[%s294_s0] sm:$0x3]  ;;  %v1232_v5 = vmov %v1596_v5  ;;  %v1269_v6 = vmov %v1598_v6 }
   0xb   :  { %v268_v9 = vld [vmem:[#allocation3] sm:$0x3]  ;;  %265 = vst [vmem:[#allocation0] sm:$0x3] %v264_v8  ;;  %v305_v14 = vsel %vm304_vm0, 1.0, %v301_v12  ;;  %v1249_v5 = vmov %v1596_v5  ;;  %v1252_v6 = vmov %v1598_v6  ;;  %vm1279_vm4 = vcmp.eq.s32.totalorder %v1269_v6, %v1266_v5 }
   0xc   :  { %269 = vst [vmem:[#allocation2] sm:$0x3] %v268_v9  ;;  %v272_v10 = vld [vmem:[#allocation5] sm:$0x3]  ;;  %306 = vst [vmem:[%s294_s0] sm:$0x3] %v305_v14 }
   0xd   :  { %v276_v11 = vld [vmem:[#allocation7] sm:$0x3]  ;;  %273 = vst [vmem:[#allocation4] sm:$0x3] %v272_v10 }
   0xe   :  { %277 = vst [vmem:[#allocation6] sm:$0x3] %v276_v11  ;;  %v314_v13 = vld [vmem:[%s307_s1] sm:$0x3] }
   0xf   :  { %v318_v15 = vsel %vm317_vm1, 1.0, %v314_v13 }
  0x10   :  { %319 = vst [vmem:[%s307_s1] sm:$0x3] %v318_v15 }
  0x12   :  { %v279_v16 = vld [vmem:[#allocation0] sm:$0xff] }
  0x13   :  { %v282_v17 = vld [vmem:[#allocation2] sm:$0xff]  ;;  %280 = vst [vmem:[%s278_s2] sm:$0xff] %v279_v16 }
  0x14   :  { %283 = vst [vmem:[%s281_s3] sm:$0xff] %v282_v17  ;;  %v285_v18 = vld [vmem:[#allocation4] sm:$0xff] }
  0x15   :  { %v288_v19 = vld [vmem:[#allocation6] sm:$0xff]  ;;  %286 = vst [vmem:[%s284_s17] sm:$0xff] %v285_v18 }
  0x16   :  { %289 = vst [vmem:[%s287_s18] sm:$0xff] %v288_v19 }
  0x1a   :  { %v1225_v20 = vld [vmem:[%s1219_s19] sm:$0x3] }
  0x1b   :  { %v1242_v21 = vld [vmem:[%s1236_s20] sm:$0x3]  ;;  %v1226_v22 = vsel %vm1223_vm2, %v1225_v20, 0.0 }
  0x1c   :  { %v1243_v23 = vsel %vm1223_vm2, %v1242_v21, 0.0  ;;  %v1259_v24 = vld [vmem:[%s1253_s21] sm:$0x3]  ;;  %v1227_v26 = vmul.f32 %v1226_v22, %v1226_v22 }
  0x1d   :  { %v1276_v25 = vld [vmem:[%s1270_s22] sm:$0x3]  ;;  %v1244_v27 = vmul.f32 %v1243_v23, %v1243_v23  ;;  %v1260_v28 = vsel %vm1223_vm2, %v1259_v24, 0.0 }
  0x1e   :  { %v1277_v29 = vsel %vm1223_vm2, %v1276_v25, 0.0  ;;  %v1261_v30 = vmul.f32 %v1260_v28, %v1260_v28  ;;  %v1229_v33 = vsel %vm1228_vm3, 0.0, %v1227_v26 }
  0x1f   :  { %v1246_v31 = vadd.f32 %v1244_v27, %v1227_v26  ;;  %v1278_v32 = vmul.f32 %v1277_v29, %v1277_v29  ;;  %v1245_v34 = vadd.f32 %v1244_v27, %v1229_v33 }
  0x21   :  { %v1263_v35 = vadd.f32 %v1261_v30, %v1246_v31  ;;  %v1262_v36 = vadd.f32 %v1261_v30, %v1245_v34  ;;  %v1280_v37 = vsel %vm1279_vm4, 0.0, %v1278_v32 }
  0x23   :  { %v1282_v38 = vadd.f32 %v1278_v32, %v1263_v35  ;;  %v1281_v39 = vadd.f32 %v1280_v37, %v1262_v36 }
  0x25   :  { %1283 = vadd.xlane.f32.xlu0 %v1282_v38 }
  0x29   :  { %1291 = vadd.xlane.f32.xlu0 %v1281_v39 }
  0xb2   :  { %v1284_v40 = vpop.xlane.xlu0 %1283 }
  0xb3   :  { %v1285_v41 = vrot.slane %v1284_v40, 4 }
  0xb5   :  { %v1286_v42 = vadd.f32 %v1285_v41, %v1284_v40 }
  0xb6   :  { %v1292_v43 = vpop.xlane.xlu0 %1291 }
  0xb7   :  { %v1287_v44 = vrot.slane %v1286_v42, 2  ;;  %v1293_v45 = vrot.slane %v1292_v43, 4 }
  0xb9   :  { %v1294_v46 = vadd.f32 %v1293_v45, %v1292_v43  ;;  %v1288_v47 = vadd.f32 %v1287_v44, %v1286_v42 }
  0xbb   :  { %v1295_v48 = vrot.slane %v1294_v46, 2  ;;  %v1289_v50 = vrot.slane %v1288_v47, 1 }
  0xbd   :  { %v1296_v49 = vadd.f32 %v1295_v48, %v1294_v46  ;;  %v1290_v53 = vadd.f32 %v1289_v50, %v1288_v47 }
  0xbf   :  { %v1297_v51 = vrot.slane %v1296_v49, 1 }
  0xc1   :  { %v1298_v52 = vadd.f32 %v1297_v51, %v1296_v49 }
  0xc3   :  { %1378 = vpush %v1298_v52 }
  0xc4   :  { %1380 = vpush %v1290_v53 }
  0xf4   :  { %s1379_s23 = spop %1378 }
  0xf5   :  { %s1381_s24 = spop %1380 }
  0xf6   :  { %s1301_s25 = smul.f32 1e-10, %s1381_s24 }
  0xf8   :  { %p1302_p0 = scmp.le.f32.partialorder %s1379_s23, %s1301_s25 }
  0xf9   :  { %s1622_s26 = smov (!%p1302_p0), 0  }
  0xfa   :  { %1305 = sbr.rel (%p1302_p0) target bundleno = 932 (0x3a4), region = 324 }
 0x101 LB: > { %s1627_s27 = smov 0   ;;  %s1521_s26 = sphi %s1622_s26, %s1860_s26  }
 0x102 LB: >> { %s424_s28 = smov [#allocation23]  ;;  %v428_v5 = vmov %v1596_v5  ;;  %v431_v6 = vmov %v1598_v6  ;;  %s444_s29 = smov [#allocation24]  ;;  %vm747_vm14 = vcmp.eq.s32.totalorder %v1598_v6, 0  ;;  %vm759_vm15 = vcmp.eq.s32.totalorder %v1598_v6, 1  ;;  %s1525_s27 = sphi %s1627_s27, %s423_s27  }
 0x103   : >> { %v448_v5 = vmov %v1596_v5  ;;  %v451_v6 = vmov %v1598_v6  ;;  %v432_v54 = vld [vmem:[%s424_s28] sm:$0x3]  ;;  %vm435_vm5 = vcmp.eq.s32.totalorder %v431_v6, %v428_v5  ;;  %s464_s30 = smov [#allocation26]  ;;  %s425_s10 = smov [#allocation27] }
 0x104   : >> { %vm455_vm6 = vcmp.eq.s32.totalorder %v451_v6, %v448_v5  ;;  %v468_v5 = vmov %v1596_v5  ;;  %v471_v6 = vmov %v1598_v6  ;;  %v436_v55 = vsel %vm435_vm5, %v432_v54, 0.0  ;;  %v452_v56 = vld [vmem:[%s444_s29] sm:$0x3]  ;;  %s445_s11 = smov [#allocation28]  ;;  %s465_s12 = smov [#allocation29] }
 0x105   : >> { %vm475_vm7 = vcmp.eq.s32.totalorder %v471_v6, %v468_v5  ;;  %v437_v57 = vrot.slane %v436_v55, 4  ;;  %v456_v58 = vsel %vm455_vm6, %v452_v56, 0.0  ;;  %v472_v59 = vld [vmem:[%s464_s30] sm:$0x3]  ;;  %s488_s13 = smov [#allocation28]  ;;  %s486_s14 = smov [#allocation27]  ;;  %v537_v5 = vmov %v1596_v5 }
 0x106   : >> { %v457_v60 = vrot.slane %v456_v58, 4  ;;  %v476_v61 = vsel %vm475_vm7, %v472_v59, 0.0  ;;  %s490_s15 = smov [#allocation29]  ;;  %s525_s16 = smov [#allocation30]  ;;  %v540_v6 = vmov %v1598_v6  ;;  %v552_v5 = vmov %v1596_v5 }
 0x107   : >> { %v438_v62 = vadd.f32 %v437_v57, %v436_v55  ;;  %v477_v63 = vrot.slane %v476_v61, 4  ;;  %s527_s0 = smov [#allocation31]  ;;  %s484_s1 = smov [#allocation32]  ;;  %v555_v6 = vmov %v1598_v6  ;;  %vm542_vm12 = vcmp.eq.s32.totalorder %v540_v6, %v537_v5 }
 0x108   : >> { %v458_v0 = vadd.f32 %v457_v60, %v456_v58  ;;  %s485_s2 = smov [#allocation33]  ;;  %s529_s1 = smov %s484_s1  ;;  %vm557_vm13 = vcmp.eq.s32.totalorder %v555_v6, %v552_v5  ;;  %v650_v5 = vmov %v1596_v5  ;;  %v653_v6 = vmov %v1598_v6 }
 0x109   : >> { %v439_v1 = vrot.slane %v438_v62, 2  ;;  %v478_v2 = vadd.f32 %v477_v63, %v476_v61  ;;  %s531_s2 = smov %s485_s2  ;;  %s533_s3 = smov [#allocation32]  ;;  %v664_v5 = vmov %v1596_v5  ;;  %v667_v6 = vmov %v1598_v6 }
 0x10a   : >> { %v459_v3 = vrot.slane %v458_v0, 2  ;;  %s548_s17 = smov [#allocation33]  ;;  %s546_s18 = smov [#allocation34]  ;;  %vm657_vm0 = vcmp.eq.s32.totalorder %v653_v6, %v650_v5  ;;  %v623_v5 = vmov %v1596_v5  ;;  %v626_v6 = vmov %v1598_v6 }
 0x10b   : >> { %v440_v4 = vadd.f32 %v439_v1, %v438_v62  ;;  %v479_v7 = vrot.slane %v478_v2, 2  ;;  %s563_s19 = smov [#allocation34]  ;;  %s1642_s20 = smov [#allocation23]  ;;  %v637_v5 = vmov %v1596_v5  ;;  %v640_v6 = vmov %v1598_v6 }
 0x10c   : >> { %v460_v8 = vadd.f32 %v459_v3, %v458_v0  ;;  %s561_s21 = smov [#allocation35]  ;;  %s1644_s22 = smov [#allocation24]  ;;  %v571_v53 = vld [vmem:[%s1642_s20] sm:$0x3]  ;;  %vm672_vm1 = vcmp.eq.s32.totalorder %v667_v6, %v664_v5  ;;  %vm631_vm3 = vcmp.eq.s32.totalorder %v626_v6, %v623_v5  ;;  %vm644_vm4 = vcmp.eq.s32.totalorder %v640_v6, %v637_v5 }
 0x10d   : >> { %v441_v9 = vrot.slane %v440_v4, 1  ;;  %v480_v10 = vadd.f32 %v479_v7, %v478_v2  ;;  %s1646_s23 = smov [#allocation25]  ;;  %s1648_s24 = smov [#allocation26]  ;;  %v572_v54 = vld [vmem:[%s1644_s22] sm:$0x3]  ;;  %vm686_vm5 = vcmp.eq.s32.totalorder %v1596_v5, 0 }
 0x10e   : >> { %v461_v11 = vrot.slane %v460_v8, 1  ;;  %s1650_s25 = smov [#allocation12]  ;;  %s1652_s28 = smov [#allocation15]  ;;  %v573_v55 = vld [vmem:[%s1646_s23] sm:$0x3]  ;;  %vm690_vm6 = vcmp.eq.s32.totalorder %v1596_v5, 1 }
 0x10f   : >> { %v442_v12 = vadd.f32 %v441_v9, %v440_v4  ;;  %v481_v13 = vrot.slane %v480_v10, 1  ;;  %s1654_s29 = smov [#allocation18]  ;;  %s787_s30 = smov [#allocation34]  ;;  %v574_v56 = vld [vmem:[%s1648_s24] sm:$0x3] }
 0x110   : >> { %v462_v14 = vadd.f32 %v461_v11, %v460_v8  ;;  %v795_v57 = vld [vmem:[%s1650_s25] sm:$0x3]  ;;  %s423_s27 = sadd.s32 1, %s1525_s27  }
 0x111   : >> { %443 = vst [vmem:[%s425_s10] sm:$0x1] %v442_v12  ;;  %v482_v15 = vadd.f32 %v481_v13, %v480_v10  ;;  %s1658_s10 = smov [#allocation20]  ;;  %v796_v58 = vld [vmem:[%s1652_s28] sm:$0x3]  ;;  %p420_p1 = scmp.ge.s32.totalorder %s423_s27, 3  }
 0x112   : >> { %463 = vst [vmem:[%s445_s11] sm:$0x1] %v462_v14  ;;  %v797_v59 = vld [vmem:[%s1654_s29] sm:$0x3]  ;;  %s565_s11 = smov [#allocation35]  ;;  %v324_v5 = vmov (%p420_p1), %v1596_v5  ;;  %v327_v6 = vmov (%p420_p1), %v1598_v6 }
 0x113   : >> { %483 = vst [vmem:[%s465_s12] sm:$0x1] %v482_v15  ;;  %v798_v61 = vld [vmem:[%s1658_s10] sm:$0x3]  ;;  %s789_s12 = smov [#allocation35]  ;;  %v377_v5 = vmov (%p420_p1), %v1596_v5  ;;  %vm339_vm7 = vcmp.eq.s32.totalorder (%p420_p1), %v327_v6, %v324_v5  ;;  %v380_v6 = vmov (%p420_p1), %v1598_v6 }
 0x114   : > { %v343_v5 = vmov (%p420_p1), %v1596_v5  ;;  %v346_v6 = vmov (%p420_p1), %v1598_v6 }
 0x115   : > { %v360_v5 = vmov (%p420_p1), %v1596_v5  ;;  %v363_v6 = vmov (%p420_p1), %v1598_v6 }
 0x118   : >> { %v487_v18 = vld [vmem:[%s486_s14] sm:$0xff]  ;;  %s593_s14 = smov [#allocation33] }
 0x119   : >> { %v489_v16 = vld [vmem:[%s488_s13] sm:$0xff]  ;;  %v510_v31 = vand.u32 2147483647, %v487_v18  ;;  %s591_s13 = smov [#allocation32] }
 0x11a   : >> { %v493_v17 = vmul.f32 2.0, %v489_v16  ;;  %v491_v19 = vld [vmem:[%s490_s15] sm:$0xff]  ;;  %v511_v36 = vand.u32 2147483647, %v489_v16  ;;  %s1674_s15 = smov [#allocation12] }
 0x11b   : >> { %v492_v20 = vsub.f32 %v491_v19, %v487_v18  ;;  %v512_v32 = vand.u32 2147483647, %v491_v19 }
 0x11c   : >> { %1409 = vrcp.f32 %v493_v17 }
 0x11d   : >> { %v513_v35 = vmin.f32 %v510_v31, %v512_v32 }
 0x11f   : >> { %v514_v37 = vmul.f32 1.1920929e-08, %v513_v35 }
 0x121   : >> { %vm515_vm11 = vcmp.le.f32.partialorder %v511_v36, %v514_v37 }
 0x126   : >> { %v1410_v21 = vpop.eup %1409 }
 0x127   : >> { %v495_v22 = vmul.f32 %v1410_v21, %v492_v20 }
 0x129   : >> { %v497_v23 = vmul.f32 %v495_v22, %v495_v22  ;;  %vm496_vm10 = vcmp.ge.f32.partialorder %v495_v22, 0.0 }
 0x12b   : >> { %v498_v24 = vadd.f32 1.0, %v497_v23 }
 0x12d   : >> { %1411 = vrsqrt.f32 %v498_v24  ;;  %vm501_vm8 = vcmp.eq.f32.partialorder %v498_v24, inf  ;;  %v504_v26 = vand.u32 2147483648, %v498_v24  ;;  %vm503_vm9 = vcmp.eq.f32.partialorder %v498_v24, 0.0 }
 0x137   : >> { %v1412_v25 = vpop.eup %1411 }
 0x138   : >> { %v500_v27 = vmul.f32 %v1412_v25, %v498_v24 }
 0x13a   : >> { %v502_v28 = vsel %vm501_vm8, %v498_v24, %v500_v27  ;;  %vm392_vm8 = vcmp.eq.s32.totalorder (%p420_p1), %v380_v6, %v377_v5 }
 0x13b   : >> { %v505_v29 = vsel %vm503_vm9, %v504_v26, %v502_v28 }
 0x13c   : >> { %v506_v30 = vxor.u32 2147483648, %v505_v29 }
 0x13e   : >> { %v507_v33 = vsel %vm496_vm10, %v505_v29, %v506_v30 }
 0x13f   : >> { %v508_v34 = vadd.f32 %v507_v33, %v495_v22 }
 0x141   : >> { %1413 = vrcp.f32 %v508_v34 }
 0x14b   : >> { %v1414_v38 = vpop.eup %1413 }
 0x14c   : >> { %v516_v39 = vsel %vm515_vm11, 0.0, %v1414_v38 }
 0x14d   : >> { %v517_v40 = vmul.f32 %v516_v39, %v516_v39  ;;  %v521_v41 = vmul.f32 %v516_v39, %v489_v16 }
 0x14f   : >> { %v518_v42 = vadd.f32 1.0, %v517_v40  ;;  %v522_v43 = vsub.f32 %v487_v18, %v521_v41  ;;  %v524_v44 = vadd.f32 %v521_v41, %v491_v19 }
 0x151   : >> { %1415 = vrsqrt.f32 %v518_v42  ;;  %526 = vst [vmem:[%s525_s16] sm:$0xff] %v522_v43  ;;  %528 = vst [vmem:[%s527_s0] sm:$0xff] %v524_v44  ;;  %s1676_s16 = smov [#allocation25]  ;;  %s1678_s0 = smov [#allocation26] }
 0x15b   : >> { %v1416_v45 = vpop.eup %1415 }
 0x15c   : >> { %530 = vst [vmem:[%s529_s1] sm:$0xff] %v1416_v45  ;;  %v520_v46 = vmul.f32 %v1416_v45, %v516_v39  ;;  %s1680_s1 = smov [#allocation23] }
 0x15e   : >> { %532 = vst [vmem:[%s531_s2] sm:$0xff] %v520_v46  ;;  %s1682_s2 = smov [#allocation18] }
 0x163   : >> { %v534_v47 = vld [vmem:[%s533_s3] ss:$0 sm:$0xff]  ;;  %s1684_s3 = smov [#allocation15] }
 0x164   : >> { %v543_v48 = vsel %vm542_vm12, %v534_v47, 0.0  ;;  %v592_v27 = vld [vmem:[%s591_s13] ss:$0 sm:$0xff]  ;;  %s763_s13 = smov [#allocation24] }
 0x165   : >> { %544 = vadd.xlane.f32.xlu0 %v543_v48  ;;  %v549_v49 = vld [vmem:[%s548_s17] ss:$0 sm:$0xff]  ;;  %s1688_s17 = smov [#allocation20] }
 0x166   : >> { %v558_v50 = vsel %vm557_vm13, %v549_v49, 0.0  ;;  %v594_v28 = vld [vmem:[%s593_s14] ss:$0 sm:$0xff]  ;;  %s740_s14 = smov [#allocation25] }
 0x169   : >> { %559 = vadd.xlane.f32.xlu0 %v558_v50 }
 0x1f2   : >> { %v545_v51 = vpop.xlane.xlu0 %544 }
 0x1f3   : >> { %547 = vst [vmem:[%s546_s18] sm:$0xff] %v545_v51  ;;  %s1690_s18 = smov [#allocation24] }
 0x1f6   : >> { %v560_v52 = vpop.xlane.xlu0 %559 }
 0x1f7   : >> { %562 = vst [vmem:[%s561_s21] sm:$0xff] %v560_v52  ;;  %s660_s21 = smov [#allocation26] }
 0x1fa   : >> { %v564_v60 = vld [vmem:[%s563_s19] sm:$0xff]  ;;  %s661_s19 = smov [#allocation31] }
 0x1fb   : >> { %v788_v62 = vld [vmem:[%s787_s30] sm:$0xff]  ;;  %v575_v63 = vmul.f32 %v571_v53, %v564_v60  ;;  %v578_v0 = vmul.f32 %v572_v54, %v564_v60  ;;  %v582_v1 = vmul.f32 %v573_v55, %v564_v60  ;;  %v585_v2 = vmul.f32 %v574_v56, %v564_v60  ;;  %s676_s30 = smov [#allocation24] }
 0x1fc   : >> { %v799_v3 = vmul.f32 %v795_v57, %v788_v62  ;;  %v802_v4 = vmul.f32 %v796_v58, %v788_v62  ;;  %v806_v7 = vmul.f32 %v797_v59, %v788_v62  ;;  %v809_v8 = vmul.f32 %v798_v61, %v788_v62 }
 0x1fe   : >> { %v566_v9 = vld [vmem:[%s565_s11] sm:$0xff]  ;;  %s1735_s11 = smov [#allocation26] }
 0x1ff   : >> { %v790_v10 = vld [vmem:[%s789_s12] sm:$0xff]  ;;  %v576_v11 = vmul.f32 %v573_v55, %v566_v9  ;;  %v579_v12 = vmul.f32 %v574_v56, %v566_v9  ;;  %v581_v13 = vmul.f32 %v571_v53, %v566_v9  ;;  %v584_v14 = vmul.f32 %v572_v54, %v566_v9  ;;  %s739_s12 = smov [#allocation23] }
 0x200   : >> { %v800_v15 = vmul.f32 %v797_v59, %v790_v10  ;;  %v803_v16 = vmul.f32 %v798_v61, %v790_v10  ;;  %v805_v17 = vmul.f32 %v795_v57, %v790_v10  ;;  %v808_v18 = vmul.f32 %v796_v58, %v790_v10  ;;  %v668_v59 = vld [vmem:[%s661_s19] ss:$0 sm:$0xff] }
 0x201   : >> { %v577_v19 = vsub.f32 %v575_v63, %v576_v11  ;;  %v580_v20 = vsub.f32 %v578_v0, %v579_v12  ;;  %v583_v21 = vadd.f32 %v582_v1, %v581_v13  ;;  %v586_v22 = vadd.f32 %v585_v2, %v584_v14 }
 0x202   : >> { %v801_v23 = vsub.f32 %v799_v3, %v800_v15  ;;  %v804_v24 = vsub.f32 %v802_v4, %v803_v16  ;;  %v807_v25 = vadd.f32 %v806_v7, %v805_v17  ;;  %v810_v26 = vadd.f32 %v809_v8, %v808_v18 }
 0x203   : >> { %588 = vst [vmem:[%s1644_s22] sm:$0x3] %v580_v20  ;;  %590 = vst [vmem:[%s1648_s24] sm:$0x3] %v586_v22  ;;  %s620_s22 = smov [#allocation30]  ;;  %s634_s24 = smov [#allocation24] }
 0x204   : >> { %587 = vst [vmem:[%s1642_s20] sm:$0x3] %v577_v19  ;;  %589 = vst [vmem:[%s1646_s23] sm:$0x3] %v583_v21  ;;  %s647_s20 = smov [#allocation25]  ;;  %s619_s23 = smov [#allocation23]  ;;  %v627_v63 = vld [vmem:[%s620_s22] ss:$0 sm:$0xff] }
 0x205   : >> { %811 = vst [vmem:[%s1650_s25] sm:$0x3] %v801_v23  ;;  %812 = vst [vmem:[%s1652_s28] sm:$0x3] %v804_v24  ;;  %s1732_s25 = smov [#allocation25]  ;;  %s1528_s28 = smov 1  }
 0x206   : >> { %813 = vst [vmem:[%s1654_s29] sm:$0x3] %v807_v25  ;;  %814 = vst [vmem:[%s1658_s10] sm:$0x3] %v810_v26  ;;  %s675_s29 = smov [#allocation23]  ;;  %s1529_s10 = smov 127  }
 0x20a   : >> { %v602_v30 = vld [vmem:[%s1678_s0] sm:$0x3] }
 0x20b   : >> { %v601_v29 = vld [vmem:[%s1676_s16] sm:$0x3]  ;;  %v610_v36 = vmul.f32 %v602_v30, %v594_v28  ;;  %v613_v42 = vmul.f32 %v602_v30, %v592_v27 }
 0x20c   : >> { %v599_v31 = vld [vmem:[%s1680_s1] sm:$0x3]  ;;  %v609_v35 = vmul.f32 %v601_v29, %v592_v27  ;;  %v612_v37 = vmul.f32 %v601_v29, %v594_v28 }
 0x20d   : >> { %v817_v32 = vld [vmem:[%s1674_s15] ss:$0 sm:$0xff]  ;;  %v1365_v34 = vld [vmem:[%s1674_s15 + $0x1] ss:$0 sm:$0xff]  ;;  %v603_v48 = vmul.f32 %v599_v31, %v592_v27  ;;  %v606_v49 = vmul.f32 %v599_v31, %v594_v28 }
 0x20e   : >> { %v1364_v33 = vld [vmem:[%s1674_s15 - $0x1] sm:$0x2]  ;;  %v1367_v40 = vld [vmem:[%s1682_s2 + $0x1] sm:$0x1]  ;;  %v611_v47 = vsub.f32 %v609_v35, %v610_v36  ;;  %v614_v53 = vadd.f32 %v613_v42, %v612_v37 }
 0x20f   : >> { %v824_v38 = vsel %vm747_vm14, %v817_v32, %v1364_v33  ;;  %v828_v39 = vld [vmem:[%s1682_s2] ss:$0 sm:$0xff]  ;;  %v836_v43 = vsel %vm759_vm15, %v1365_v34, %v1367_v40  ;;  %v1369_v45 = vld [vmem:[%s1684_s3 + $0x1] ss:$0 sm:$0xff] }
 0x210   : >> { %v841_v41 = vld [vmem:[%s1684_s3] ss:$0 sm:$0xff]  ;;  %827 = vst [vmem:[%s1674_s15] sm:$0x3] %v824_v38  ;;  %838 = vst [vmem:[%s1682_s2] sm:$0x3] %v836_v43  ;;  %v1371_v51 = vld [vmem:[%s1688_s17 + $0x1] sm:$0x1] }
 0x211   : >> { %v1368_v44 = vld [vmem:[%s1684_s3 - $0x1] sm:$0x2]  ;;  %1366 = vst [vmem:[%s1674_s15 + $0x1] sm:$0x1] %v828_v39  ;;  %v860_v54 = vsel %vm759_vm15, %v1369_v45, %v1371_v51  ;;  %617 = vst [vmem:[%s1676_s16] sm:$0x3] %v611_v47  ;;  %s764_s15 = smov [#allocation26] }
 0x212   : >> { %v852_v46 = vld [vmem:[%s1688_s17] ss:$0 sm:$0xff]  ;;  %v848_v50 = vsel %vm747_vm14, %v841_v41, %v1368_v44  ;;  %618 = vst [vmem:[%s1678_s0] sm:$0x3] %v614_v53  ;;  %s863_s16 = sadd.s32 (%p420_p1), 1, %s1521_s26   ;;  %s328_s0 = smov (%p420_p1), [#allocation23] }
 0x213   : >> { %v600_v52 = vld [vmem:[%s1690_s18] sm:$0x3]  ;;  %851 = vst [vmem:[%s1684_s3] sm:$0x3] %v848_v50  ;;  %862 = vst [vmem:[%s1688_s17] sm:$0x3] %v860_v54  ;;  %s364_s2 = smov (%p420_p1), [#allocation25]  ;;  %p416_p2 = scmp.ge.s32.totalorder (%p420_p1), %s863_s16, 15 }
 0x214   : >> { %v604_v55 = vmul.f32 %v600_v52, %v594_v28  ;;  %v607_v56 = vmul.f32 %v600_v52, %v592_v27  ;;  %1370 = vst [vmem:[%s1684_s3 + $0x1] sm:$0x1] %v852_v46  ;;  %s381_s3 = smov (%p420_p1), [#allocation26]  ;;  %s1860_s26 = smov (%p420_p1), %s863_s16 }
 0x216   : >> { %v605_v57 = vsub.f32 %v603_v48, %v604_v55  ;;  %v608_v58 = vadd.f32 %v607_v56, %v606_v49 }
 0x218   : >> { %615 = vst [vmem:[%s1680_s1] sm:$0x3] %v605_v57  ;;  %616 = vst [vmem:[%s1690_s18] sm:$0x3] %v608_v58  ;;  %v654_v60 = vld [vmem:[%s647_s20] sm:$0x3]  ;;  %s347_s1 = smov (%p420_p1), [#allocation24] }
 0x219   : >> { %v658_v61 = vsel %vm657_vm0, 0.0, %v654_v60  ;;  %v669_v62 = vld [vmem:[%s660_s21] sm:$0x3] }
 0x21a   : >> { %659 = vst [vmem:[%s647_s20] sm:$0x3] %v658_v61  ;;  %v673_v0 = vsel %vm672_vm1, %v668_v59, %v669_v62 }
 0x21b   : >> { %674 = vst [vmem:[%s660_s21] sm:$0x3] %v673_v0 }
 0x21f   : >> { %v628_v1 = vld [vmem:[%s619_s23] sm:$0x3] }
 0x220   : >> { %v641_v2 = vld [vmem:[%s634_s24] sm:$0x3]  ;;  %v632_v3 = vsel %vm631_vm3, %v627_v63, %v628_v1 }
 0x221   : >> { %v645_v4 = vsel %vm644_vm4, 0.0, %v641_v2  ;;  %633 = vst [vmem:[%s619_s23] sm:$0x3] %v632_v3  ;;  %v713_v7 = vld [vmem:[%s1732_s25] sm:$0x3] }
 0x222   : >> { %646 = vst [vmem:[%s634_s24] sm:$0x3] %v645_v4  ;;  %714 = vrot.lane.b32.xlu0 %v713_v7, %s1528_s28  ;;  %v709_v11 = vld [vmem:[%s1735_s11] sm:$0x3] }
 0x223   : >> { %v730_v12 = vld [vmem:[%s1735_s11] sm:$0x3] }
 0x224   : >> { %v712_v30 = vld [vmem:[%s1732_s25] sm:$0x3] }
 0x228   : >> { %v681_v8 = vld [vmem:[%s675_s29] sm:$0x3] }
 0x229   : >> { %682 = vrot.lane.b32.xlu1 %v681_v8, %s1528_s28  ;;  %v677_v9 = vld [vmem:[%s676_s30] sm:$0x3] }
 0x22a   : >> { %v698_v10 = vld [vmem:[%s676_s30] sm:$0x3] }
 0x22b   : >> { %v680_v18 = vld [vmem:[%s675_s29] sm:$0x3] }
 0x22d   : >> { %678 = vrot.lane.b32.xlu1 %v677_v9, %s1528_s28 }
 0x231   : >> { %699 = vrot.lane.b32.xlu1 %v698_v10, %s1529_s10 }
 0x235   : >> { %710 = vrot.lane.b32.xlu1 %v709_v11, %s1528_s28 }
 0x239   : >> { %731 = vrot.lane.b32.xlu1 %v730_v12, %s1529_s10 }
 0x294   : >> { %v715_v20 = vpop.permute.xlu0 %714 }
 0x295   : >> { %v719_v22 = vsel %vm686_vm5, %v713_v7, %v715_v20 }
 0x29b   : >> { %v683_v13 = vpop.permute.xlu1 %682 }
 0x29c   : >> { %v687_v14 = vsel %vm686_vm5, %v681_v8, %v683_v13 }
 0x29f   : >> { %v679_v15 = vpop.permute.xlu1 %678 }
 0x2a0   : >> { %v691_v16 = vsel %vm690_vm6, %v679_v15, %v687_v14 }
 0x2a1   : >> { %v697_v17 = vsel %vm1223_vm2, %v691_v16, 0.0 }
 0x2a2   : >> { %705 = vst [vmem:[%s675_s29] sm:$0x3] %v697_v17 }
 0x2a3   : >> { %v700_v19 = vpop.permute.xlu1 %699 }
 0x2a4   : >> { %v704_v21 = vsel %vm690_vm6, %v680_v18, %v700_v19 }
 0x2a5   : >> { %706 = vst [vmem:[%s676_s30] sm:$0x3] %v704_v21 }
 0x2a7   : >> { %v711_v23 = vpop.permute.xlu1 %710 }
 0x2a8   : >> { %v723_v24 = vsel %vm690_vm6, %v711_v23, %v719_v22 }
 0x2a9   : >> { %v741_v25 = vld [vmem:[%s739_s12] ss:$0 sm:$0xff]  ;;  %v1357_v27 = vld [vmem:[%s739_s12 + $0x1] ss:$0 sm:$0xff]  ;;  %v729_v29 = vsel %vm1223_vm2, %v723_v24, 0.0 }
 0x2aa   : >> { %v1356_v26 = vld [vmem:[%s739_s12 - $0x1] sm:$0x2]  ;;  %737 = vst [vmem:[%s1732_s25] sm:$0x3] %v729_v29 }
 0x2ab   : >> { %v748_v28 = vsel %vm747_vm14, %v741_v25, %v1356_v26  ;;  %v732_v31 = vpop.permute.xlu1 %731 }
 0x2ac   : >> { %751 = vst [vmem:[%s739_s12] sm:$0x3] %v748_v28  ;;  %v765_v32 = vld [vmem:[%s763_s13] ss:$0 sm:$0xff]  ;;  %v1361_v34 = vld [vmem:[%s763_s13 + $0x1] ss:$0 sm:$0xff]  ;;  %v736_v35 = vsel %vm690_vm6, %v712_v30, %v732_v31 }
 0x2ad   : >> { %v1360_v33 = vld [vmem:[%s763_s13 - $0x1] sm:$0x2]  ;;  %738 = vst [vmem:[%s1735_s11] sm:$0x3] %v736_v35 }
 0x2ae   : >> { %v772_v36 = vsel %vm747_vm14, %v765_v32, %v1360_v33 }
 0x2af   : >> { %775 = vst [vmem:[%s763_s13] sm:$0x3] %v772_v36 }
 0x2b1   : >> { %v752_v37 = vld [vmem:[%s740_s14] ss:$0 sm:$0xff]  ;;  %v1359_v38 = vld [vmem:[%s740_s14 + $0x1] sm:$0x1] }
 0x2b2   : >> { %1358 = vst [vmem:[%s739_s12 + $0x1] sm:$0x1] %v752_v37  ;;  %v760_v39 = vsel %vm759_vm15, %v1357_v27, %v1359_v38  ;;  %422 = sbr.rel (!%p420_p1) target bundleno = 258 (0x102), region = 319 }
 0x2b3   : >> { %762 = vst [vmem:[%s740_s14] sm:$0x3] %v760_v39 }
 0x2b4   : >> { %v776_v40 = vld [vmem:[%s764_s15] ss:$0 sm:$0xff]  ;;  %v1363_v41 = vld [vmem:[%s764_s15 + $0x1] sm:$0x1] }
 0x2b5   : >> { %1362 = vst [vmem:[%s763_s13 + $0x1] sm:$0x1] %v776_v40  ;;  %v784_v42 = vsel %vm759_vm15, %v1361_v34, %v1363_v41 }
 0x2b6   : >> { %786 = vst [vmem:[%s764_s15] sm:$0x3] %v784_v42 }
 0x2b9   : > { %v334_v43 = vld [vmem:[%s328_s0] sm:$0x3] }
 0x2ba   : > { %v335_v45 = vsel %vm1223_vm2, %v334_v43, 0.0  ;;  %v370_v47 = vld [vmem:[%s364_s2] sm:$0x3] }
 0x2bb   : > { %v336_v49 = vmul.f32 %v335_v45, %v335_v45  ;;  %v371_v51 = vsel %vm1223_vm2, %v370_v47, 0.0 }
 0x2bc   : > { %v353_v44 = vld [vmem:[%s347_s1] sm:$0x3]  ;;  %v372_v53 = vmul.f32 %v371_v51, %v371_v51 }
 0x2bd   : > { %v354_v46 = vsel %vm1223_vm2, %v353_v44, 0.0  ;;  %v387_v48 = vld [vmem:[%s381_s3] sm:$0x3]  ;;  %v340_v56 = vsel %vm339_vm7, 0.0, %v336_v49 }
 0x2be   : > { %v355_v50 = vmul.f32 %v354_v46, %v354_v46  ;;  %v388_v52 = vsel %vm1223_vm2, %v387_v48, 0.0 }
 0x2bf   : > { %v389_v55 = vmul.f32 %v388_v52, %v388_v52 }
 0x2c0   : > { %v357_v54 = vadd.f32 %v355_v50, %v336_v49  ;;  %v356_v57 = vadd.f32 %v355_v50, %v340_v56 }
 0x2c1   : > { %v393_v60 = vsel %vm392_vm8, 0.0, %v389_v55 }
 0x2c2   : > { %v374_v58 = vadd.f32 %v372_v53, %v357_v54  ;;  %v373_v59 = vadd.f32 %v372_v53, %v356_v57 }
 0x2c4   : > { %v395_v61 = vadd.f32 %v389_v55, %v374_v58  ;;  %v394_v62 = vadd.f32 %v393_v60, %v373_v59 }
 0x2c6   : > { %396 = vadd.xlane.f32.xlu0 %v395_v61 }
 0x2ca   : > { %404 = vadd.xlane.f32.xlu0 %v394_v62 }
 0x353   : > { %v397_v63 = vpop.xlane.xlu0 %396 }
 0x354   : > { %v398_v0 = vrot.slane %v397_v63, 4 }
 0x356   : > { %v399_v1 = vadd.f32 %v398_v0, %v397_v63 }
 0x357   : > { %v405_v2 = vpop.xlane.xlu0 %404 }
 0x358   : > { %v400_v3 = vrot.slane %v399_v1, 2  ;;  %v406_v4 = vrot.slane %v405_v2, 4 }
 0x35a   : > { %v407_v7 = vadd.f32 %v406_v4, %v405_v2  ;;  %v401_v8 = vadd.f32 %v400_v3, %v399_v1 }
 0x35c   : > { %v408_v9 = vrot.slane %v407_v7, 2  ;;  %v402_v11 = vrot.slane %v401_v8, 1 }
 0x35e   : > { %v409_v10 = vadd.f32 %v408_v9, %v407_v7  ;;  %v403_v14 = vadd.f32 %v402_v11, %v401_v8 }
 0x360   : > { %v410_v12 = vrot.slane %v409_v10, 1 }
 0x362   : > { %v411_v13 = vadd.f32 %v410_v12, %v409_v10 }
 0x364   : > { %1382 = vpush %v411_v13 }
 0x365   : > { %1384 = vpush %v403_v14 }
 0x395   : > { %s1383_s27 = spop %1382 }
 0x396   : > { %s1385_s17 = spop %1384 }
 0x397   : > { %s414_s18 = smul.f32 1e-10, %s1385_s17 }
 0x399   : > { %p415_p3 = scmp.le.f32.partialorder %s1383_s27, %s414_s18 }
 0x39b   : > { %p417_p4 = por %p416_p2, %p415_p3 }
 0x39d   :  { %865 = sbr.rel (!%p417_p4) target bundleno = 257 (0x101), region = 330 }
 0x3a4 PF:  { %v927_v15 = vld [vmem:[#allocation15] sm:$0x3]  ;;  %s866_s19 = smov [#allocation23]  ;;  %v870_v5 = vmov %v1596_v5  ;;  %v873_v6 = vmov %v1598_v6  ;;  %v921_v16 = vld [vmem:[#allocation12] sm:$0x3]  ;;  %s1530_s20 = smov [#allocation16]  }
 0x3a5   :  { %v890_v5 = vmov %v1596_v5  ;;  %v893_v6 = vmov %v1598_v6  ;;  %929 = vst [vmem:[#allocation16] sm:$0x3] %v927_v15  ;;  %s1080_s21 = sshll.u32 %s1530_s20, 4  ;;  %v874_v17 = vld [vmem:[%s866_s19] sm:$0x3]  ;;  %vm877_vm9 = vcmp.eq.s32.totalorder %v873_v6, %v870_v5  ;;  %s886_s26 = smov [#allocation26]  ;;  %s1081_s21 = int_to_ptr.vmem [resolvable:$true] %s1080_s21 }
 0x3a6   :  { %vm897_vm10 = vcmp.eq.s32.totalorder %v893_v6, %v890_v5  ;;  %923 = vst [vmem:[#allocation13] sm:$0x3] %v921_v16  ;;  %v933_v18 = vld [vmem:[#allocation18] sm:$0x3]  ;;  %v878_v19 = vsel %vm877_vm9, %v874_v17, 0.0  ;;  %s1417_s22 = scalar_lea.vmem %s1081_s21, 32  ;;  %p1422_p6 = scmp.lt.s32.totalorder %s1081_s21, %s1081_s21 }
 0x3a7   :  { %935 = vst [vmem:[#allocation19] sm:$0x3] %v933_v18  ;;  %v939_v20 = vld [vmem:[#allocation20] sm:$0x3]  ;;  %p1418_p5 = scmp.ne.s32.totalorder %s1081_s21, %s1417_s22  ;;  %p1423_p7 = scmp.lt.s32.totalorder %s1417_s22, %s1417_s22 }
 0x3a9   :  { %p1424_p8 = por %p1423_p7, %p1422_p6 }
 0x3ab   :  { %p1425_p9 = pnand %p1424_p8, %p1418_p5 }
 0x3ad   :  { %1428 = shalt.err (!%p1425_p9)
}
 0x3ae   :  { %s1429_s25 = scalar_lea.hbm %s1857_s7, 32 }
 0x3af   :  { %p1430_p10 = scmp.ne.s32.totalorder %s1857_s7, %s1429_s25  ;;  %p1433_p11 = scmp.lt.u32.totalorder %s1429_s25, %s1857_s7 }
 0x3b1   :  { %p1435_p12 = pnand %p1433_p11, %p1430_p10 }
 0x3b3   :  { %1438 = shalt.err (!%p1435_p12)
}
 0x3b4   :  { %1083 = dma.vmem_to_hbm [thread:$0]  %s1081_s21, 32, %s1857_s7, [#allocation17]   ;;  %v879_v21 = vrot.slane %v878_v19, 4  ;;  %v894_v22 = vld [vmem:[%s886_s26] sm:$0x3] }
 0x3b5   :  { %941 = vst [vmem:[#allocation21] sm:$0x3] %v939_v20  ;;  %v898_v23 = vsel %vm897_vm10, %v894_v22, 0.0  ;;  %s1531_s13 = smov [#allocation13]   ;;  %s1532_s15 = smov [#allocation19]  }
 0x3b6   :  { %v880_v24 = vadd.f32 %v879_v21, %v878_v19  ;;  %v899_v25 = vrot.slane %v898_v23, 4  ;;  %s1073_s14 = sshll.u32 %s1531_s13, 4  ;;  %s1087_s16 = sshll.u32 %s1532_s15, 4  ;;  %s1074_s14 = int_to_ptr.vmem [resolvable:$true] %s1073_s14  ;;  %s1088_s16 = int_to_ptr.vmem [resolvable:$true] %s1087_s16 }
 0x3b7   :  { %s1439_s0 = scalar_lea.vmem %s1074_s14, 32  ;;  %p1444_p0 = scmp.lt.s32.totalorder %s1074_s14, %s1074_s14 }
 0x3b8   :  { %v881_v26 = vrot.slane %v880_v24, 2  ;;  %v900_v27 = vadd.f32 %v899_v25, %v898_v23  ;;  %p1440_p13 = scmp.ne.s32.totalorder %s1074_s14, %s1439_s0  ;;  %p1445_p1 = scmp.lt.s32.totalorder %s1439_s0, %s1439_s0 }
 0x3ba   :  { %p1446_p2 = por %p1445_p1, %p1444_p0 }
 0x3bc   :  { %p1447_p3 = pnand %p1446_p2, %p1440_p13 }
 0x3be   :  { %1450 = shalt.err (!%p1447_p3)
}
 0x3bf   :  { %s1451_s2 = scalar_lea.hbm %s1856_s6, 32 }
 0x3c0   :  { %p1452_p4 = scmp.ne.s32.totalorder %s1856_s6, %s1451_s2  ;;  %p1455_p5 = scmp.lt.u32.totalorder %s1451_s2, %s1856_s6 }
 0x3c2   :  { %p1457_p6 = pnand %p1455_p5, %p1452_p4 }
 0x3c4   :  { %1460 = shalt.err (!%p1457_p6)
}
 0x3c5   :  { %1076 = dma.vmem_to_hbm [thread:$0]  %s1074_s14, 32, %s1856_s6, [#allocation14]   ;;  %v882_v5 = vadd.f32 %v881_v26, %v880_v24  ;;  %v901_v6 = vrot.slane %v900_v27, 2 }
 0x3c6   :  { %s1461_s21 = scalar_lea.vmem %s1088_s16, 32  ;;  %p1466_p8 = scmp.lt.s32.totalorder %s1088_s16, %s1088_s16 }
 0x3c7   :  { %p1462_p7 = scmp.ne.s32.totalorder %s1088_s16, %s1461_s21  ;;  %p1467_p9 = scmp.lt.s32.totalorder %s1461_s21, %s1461_s21 }
 0x3c9   :  { %p1468_p10 = por %p1467_p9, %p1466_p8 }
 0x3cb   :  { %p1469_p11 = pnand %p1468_p10, %p1462_p7 }
 0x3cd   :  { %1472 = shalt.err (!%p1469_p11)
}
 0x3ce   :  { %s1473_s23 = scalar_lea.hbm %s1858_s8, 32 }
 0x3cf   :  { %p1474_p12 = scmp.ne.s32.totalorder %s1858_s8, %s1473_s23  ;;  %p1477_p13 = scmp.lt.u32.totalorder %s1473_s23, %s1858_s8 }
 0x3d1   :  { %p1479_p0 = pnand %p1477_p13, %p1474_p12 }
 0x3d3   :  { %1482 = shalt.err (!%p1479_p0)
}
 0x3d4   :  { %1090 = dma.vmem_to_hbm [thread:$0]  %s1088_s16, 32, %s1858_s8, [#allocation17]   ;;  %v883_v28 = vrot.slane %v882_v5, 1  ;;  %v902_v29 = vadd.f32 %v901_v6, %v900_v27 }
 0x3d5   :  { %s1533_s10 = smov [#allocation21]   ;;  %s867_s12 = smov [#allocation8] }
 0x3d6   :  { %s1094_s11 = sshll.u32 %s1533_s10, 4  ;;  %s1095_s11 = int_to_ptr.vmem [resolvable:$true] %s1094_s11 }
 0x3d7   :  { %s1483_s13 = scalar_lea.vmem %s1095_s11, 32  ;;  %p1488_p2 = scmp.lt.s32.totalorder %s1095_s11, %s1095_s11 }
 0x3d8   :  { %p1484_p1 = scmp.ne.s32.totalorder %s1095_s11, %s1483_s13  ;;  %p1489_p3 = scmp.lt.s32.totalorder %s1483_s13, %s1483_s13 }
 0x3da   :  { %p1490_p4 = por %p1489_p3, %p1488_p2 }
 0x3dc   :  { %p1491_p5 = pnand %p1490_p4, %p1484_p1 }
 0x3de   :  { %1494 = shalt.err (!%p1491_p5)
}
 0x3df   :  { %s1495_s0 = scalar_lea.hbm %s1859_s9, 32 }
 0x3e0   :  { %p1496_p6 = scmp.ne.s32.totalorder %s1859_s9, %s1495_s0  ;;  %p1499_p7 = scmp.lt.u32.totalorder %s1495_s0, %s1859_s9 }
 0x3e2   :  { %p1501_p8 = pnand %p1499_p7, %p1496_p6 }
 0x3e4   :  { %1504 = shalt.err (!%p1501_p8)
}
 0x3e5   :  { %1097 = dma.vmem_to_hbm [thread:$0]  %s1095_s11, 32, %s1859_s9, [#allocation22]   ;;  %v884_v30 = vadd.f32 %v883_v28, %v882_v5  ;;  %v903_v31 = vrot.slane %v902_v29, 1 }
 0x3e6   :  { %s887_s27 = smov [#allocation10] }
 0x3e7   :  { %885 = vst [vmem:[%s867_s12] sm:$0x1] %v884_v30  ;;  %v904_v32 = vadd.f32 %v903_v31, %v902_v29 }
 0x3e9   :  { %905 = vst [vmem:[%s887_s27] sm:$0x1] %v904_v32 }
 0x3ee   :  { %v909_v33 = vld [vmem:[#allocation8] sm:$0x1] }
 0x3ef   :  { %911 = vst [vmem:[#allocation9] sm:$0x1] %v909_v33 }
 0x3f0   :  { %v915_v34 = vld [vmem:[#allocation10] sm:$0x1] }
 0x3f1   :  { %917 = vst [vmem:[#allocation11] sm:$0x1] %v915_v34 }
 0x3f6   :  { %v1004_v35 = vld [vmem:[#allocation9] sm:$0x1] }
 0x3f7   :  { %1005 = vst [vmem:[%s1854_s4] sm:$0x1] %v1004_v35 }
 0x3f8   :  { %v1068_v36 = vld [vmem:[#allocation11] sm:$0x1] }
 0x3f9   :  { %1069 = vst [vmem:[%s1855_s5] sm:$0x1] %v1068_v36 }
 0x3fa   :  { %1513 = dma.done.wait [#allocation14], 32  }
 0x3fb   :  { %1514 = vsyncadd [#allocation14], 4294967264 }
 0x3fc   :  { %1515 = dma.done.wait [#allocation17], 64  }
 0x3fd   :  { %1516 = vsyncadd [#allocation17], 4294967232 }
 0x3fe   :  { %1517 = dma.done.wait [#allocation22], 32  }
 0x3ff   :  { %1518 = vsyncadd [#allocation22], 4294967264 }
 0x400   :  { %1106 = vsyncpa [#allocation14], 1 }
 0x401   :  { %1107 = vsyncpa [#allocation17], 1 }
 0x402   :  { %1108 = vsyncpa [#allocation22], 1 }

// kernel: class_conditional_batchnorm2d.1
= control target key start
LH: loop header
LB: loop body
LE: loop exit
PB: predicated region body
PF: predicated region fallthrough
CT: control target
= control target key end

     0   :  { %vm28_vm0 = vcmask 1043456   ;;  %v151_v20 = vmov 0   ;;  %v152_v53 = vmov 839922192   ;;  %v96_v55 = vlaneseq  ;;  %s241_s0 = inlined_call_operand.vmem [shape: f32[2,4,256], index: 0, kind: input, shape index: {}, may-alias: {0,5}]   ;;  %s242_s3 = inlined_call_operand.vmem [shape: f32[1,4,1], index: 3, kind: input, shape index: {}]   ;;  %s243_s1 = inlined_call_operand.vmem [shape: f32[2,4,1], index: 1, kind: input, shape index: {}]   ;;  %s244_s4 = inlined_call_operand.vmem [shape: f32[1,4,1], index: 4, kind: input, shape index: {}]   ;;  %s245_s2 = inlined_call_operand.vmem [shape: f32[2,4,1], index: 2, kind: input, shape index: {}]   ;;  %s246_s5 = inlined_call_operand.vmem [shape: f32[2,4,256], index: 5, kind: output, shape index: {}, may-alias: {0,5}]  }
   0x1   :  { %v186_v0 = vld [vmem:[%s241_s0] sm:$0xff]  ;;  %v191_v1 = vld [vmem:[%s241_s0 + $0x8] sm:$0xff]  ;;  %146 = vset.pattern.permute.xlu1 %v151_v20  ;;  %145 = vset.pattern.permute.xlu0 %v151_v20  ;;  %v94_v54 = vunpack.c.l.s4 %v152_v53 }
   0x2   :  { %v24_v2 = vcombine.high %v186_v0, %v186_v0  ;;  %v29_v3 = vsel %vm28_vm0, %v186_v0, 0.0  ;;  %v42_v4 = vmul.f32 %v186_v0, %v186_v0  ;;  %v25_v5 = vcombine.high %v191_v1, %v191_v1  ;;  %v70_v37 = vld [vmem:[%s242_s3] sm:$0xf]  ;;  %v73_v39 = vld [vmem:[%s243_s1 + $0x4] sm:$0xf] }
   0x3   :  { %v34_v6 = vsel %vm28_vm0, %v191_v1, 0.0  ;;  %v43_v7 = vmul.f32 %v191_v1, %v191_v1  ;;  %v72_v40 = vld [vmem:[%s243_s1] sm:$0xf]  ;;  %v82_v51 = vld [vmem:[%s245_s2 + $0x4] sm:$0xf]  ;;  %v95_v56 = vunpack.c.0.s8 %v94_v54  ;;  %v97_v57 = vshrl.u32 %v96_v55, 7 }
   0x4   :  { %v30_v8 = vsel %vm28_vm0, %v24_v2, 0.0  ;;  %v46_v9 = vcombine.high %v42_v4, %v42_v4  ;;  %v50_v10 = vsel %vm28_vm0, %v42_v4, 0.0  ;;  %v35_v11 = vsel %vm28_vm0, %v25_v5, 0.0  ;;  %v76_v42 = vld [vmem:[%s244_s4] sm:$0xf] }
   0x5   :  { %v31_v12 = vadd.f32 %v30_v8, %v29_v3  ;;  %v47_v13 = vcombine.high %v43_v7, %v43_v7  ;;  %v55_v15 = vsel %vm28_vm0, %v43_v7, 0.0  ;;  %v36_v17 = vadd.f32 %v35_v11, %v34_v6  ;;  %v81_v47 = vld [vmem:[%s245_s2] sm:$0xf] }
   0x6   :  { %v51_v14 = vsel %vm28_vm0, %v46_v9, 0.0  ;;  %v98_v58 = vsub.s32 %v95_v56, %v97_v57 }
   0x7   :  { %32 = vadd.xlane.f32.xlu0 %v31_v12  ;;  %v52_v16 = vadd.f32 %v51_v14, %v50_v10  ;;  %v56_v18 = vsel %vm28_vm0, %v47_v13, 0.0 }
   0x8   :  { %v57_v19 = vadd.f32 %v56_v18, %v55_v15 }
   0x9   :  { %53 = vadd.xlane.f32.xlu1 %v52_v16 }
   0xb   :  { %37 = vadd.xlane.f32.xlu0 %v36_v17 }
   0xd   :  { %58 = vadd.xlane.f32.xlu1 %v57_v19 }
  0x94   :  { %v33_v21 = vpop.xlane.xlu0 %32 }
  0x95   :  { %v39_v24 = vsel %vm28_vm0, %v33_v21, 0.0 }
  0x96   :  { %v54_v22 = vpop.xlane.xlu1 %53 }
  0x97   :  { %v60_v28 = vsel %vm28_vm0, %v54_v22, 0.0 }
  0x98   :  { %v38_v23 = vpop.xlane.xlu0 %37 }
  0x99   :  { %v40_v25 = vsel %vm28_vm0, %v38_v23, 0.0 }
  0x9a   :  { %v41_v26 = vadd.f32 %v40_v25, %v39_v24  ;;  %v59_v27 = vpop.xlane.xlu1 %58 }
  0x9b   :  { %v61_v29 = vsel %vm28_vm0, %v59_v27, 0.0 }
  0x9c   :  { %v63_v30 = vmul.f32 0.001953125, %v41_v26  ;;  %v62_v31 = vadd.f32 %v61_v29, %v60_v28 }
  0x9e   :  { %v65_v32 = vmul.f32 %v63_v30, %v63_v30  ;;  %v64_v33 = vmul.f32 0.001953125, %v62_v31 }
  0xa0   :  { %v66_v34 = vsub.f32 %v64_v33, %v65_v32 }
  0xa2   :  { %v67_v35 = vmax.f32 %v66_v34, 0.0 }
  0xa4   :  { %v68_v36 = vadd.f32 1e-05, %v67_v35 }
  0xa6   :  { %149 = vrsqrt.f32 %v68_v36 }
  0xb0   :  { %v150_v38 = vpop.eup %149 }
  0xb1   :  { %v71_v41 = vmul.f32 %v150_v38, %v70_v37 }
  0xb3   :  { %v75_v43 = vmul.f32 %v73_v39, %v71_v41  ;;  %v74_v44 = vmul.f32 %v72_v40, %v71_v41  ;;  %v77_v45 = vmul.f32 %v71_v41, %v63_v30 }
  0xb5   :  { %91 = vperm.xlu1 %146, %v75_v43   ;;  %87 = vperm.xlu0 %145, %v74_v44   ;;  %v78_v46 = vsub.f32 %v76_v42, %v77_v45 }
  0xb7   :  { %v79_v48 = vmul.f32 %v78_v46, %v72_v40  ;;  %v80_v50 = vmul.f32 %v78_v46, %v73_v39 }
  0xb9   :  { %v83_v49 = vadd.f32 %v81_v47, %v79_v48  ;;  %v84_v52 = vadd.f32 %v82_v51, %v80_v50 }
  0xbb   :  { %113 = vperm.xlu1 %146, %v83_v49  }
  0xbf   :  { %117 = vperm.xlu1 %146, %v84_v52  }
 0x134   :  { %v88_v59 = vpop.permute.xlu0 %87  ;;  %v92_v60 = vpop.permute.xlu1 %91 }
 0x135   :  { %v99_v61 = vrot.slane %v88_v59, %v98_v58  ;;  %v106_v63 = vrot.slane %v92_v60, %v98_v58 }
 0x137   :  { %v109_v2 = vmul.f32 %v99_v61, %v186_v0  ;;  %v110_v6 = vmul.f32 %v106_v63, %v191_v1 }
 0x13a   :  { %v114_v62 = vpop.permute.xlu1 %113 }
 0x13b   :  { %v125_v3 = vrot.slane %v114_v62, %v98_v58 }
 0x13d   :  { %v135_v4 = vadd.f32 %v125_v3, %v109_v2 }
 0x13e   :  { %v118_v5 = vpop.permute.xlu1 %117 }
 0x13f   :  { %137 = vst [vmem:[%s246_s5] sm:$0xff] %v135_v4  ;;  %v132_v7 = vrot.slane %v118_v5, %v98_v58 }
 0x141   :  { %v136_v8 = vadd.f32 %v132_v7, %v110_v6 }
 0x143   :  { %138 = vst [vmem:[%s246_s5 + $0x8] sm:$0xff] %v136_v8 }

</bundles_post_ra>
